<compile_context>
chip_gen: v7x
topology: tpu7x:2x2x1
jax: 0.10.0
libtpu: 0.0.40
codegen_flags: <defaults>
</compile_context>

<pallas_src>
import functools

import numpy as np

import jax
import jax.numpy as jnp
from jax import lax
from jax.experimental import pallas as pl
from jax.experimental.pallas import tpu as pltpu

LN_EPS = 1e-5                    # nn.LayerNorm default
MXU_DTYPE = jnp.bfloat16         # MXU operand dtype (set to jnp.float32 for exact f32)


# --------------------------------------------------------------------------
# Fused encoder-layer kernel (LN1 + windowed MHSA + res + LN2 + FFN + res
#                             + partial reduce matmul)
# --------------------------------------------------------------------------
def _encoder_layer_kernel(x_ref, mask_ref,
                          ln1w_ref, ln1b_ref, wqkv_ref, bqkv_ref,
                          wp_ref, bp_ref, ln2w_ref, ln2b_ref,
                          w1_ref, b1_ref, w2_ref, b2_ref, wred_ref,
                          o_ref, *, num_heads, scale, mxu_dtype):
    """One block of windowed tokens per grid step.

    x_ref   : (Tb, C)   tokens in window-major order (Tb % window_tokens == 0)
    mask_ref: (Tb, Tb)  additive mask: 0 inside a window, -1e30 across windows
    o_ref   : (Tb, C)   encoder-layer output @ W_reduce[layer]  (bias added outside)
    """
    Tb, C = x_ref.shape
    hd = C // num_heads

    x = x_ref[...]                                               # (Tb, C) f32

    # ---- LayerNorm 1 (f32 statistics; token-wise, so commutes with windowing) ----
    mu = jnp.mean(x, axis=-1, keepdims=True)
    var = jnp.mean((x - mu) ** 2, axis=-1, keepdims=True)
    xn = (x - mu) * lax.rsqrt(var + LN_EPS)
    xn = xn * ln1w_ref[...] + ln1b_ref[...]

    # ---- fused QKV projection over the whole token block ----
    qkv = jnp.dot(xn.astype(mxu_dtype), wqkv_ref[...],
                  preferred_element_type=jnp.float32) + bqkv_ref[...]   # (Tb, 3C)

    # ---- multi-head attention: all windows of the block batched per head ----
    amask = mask_ref[...]                                        # (Tb, Tb) f32
    head_outs = []
    for h in range(num_heads):                                   # static, tiny loop
        q = (qkv[:, h * hd:(h + 1) * hd] * scale).astype(mxu_dtype)
        k = qkv[:, C + h * hd: C + (h + 1) * hd].astype(mxu_dtype)
        v = qkv[:, 2 * C + h * hd: 2 * C + (h + 1) * hd].astype(mxu_dtype)
        s = lax.dot_general(q, k, (((1,), (1,)), ((), ())),
                            preferred_element_type=jnp.float32)         # (Tb, Tb)
        s = s + amask                                            # block-diagonal windows
        s = s - jnp.max(s, axis=-1, keepdims=True)
        e = jnp.exp(s)
        p = e * pl.reciprocal(jnp.sum(e, axis=-1, keepdims=True), approx=True)
        head_outs.append(jnp.dot(p.astype(mxu_dtype), v,
                                 preferred_element_type=jnp.float32))   # (Tb, hd)
    attn = jnp.concatenate(head_outs, axis=-1)                   # (Tb, C) f32

    # ---- output projection + residual (f32) ----
    x1 = x + (jnp.dot(attn.astype(mxu_dtype), wp_ref[...],
                      preferred_element_type=jnp.float32) + bp_ref[...])

    # ---- LayerNorm 2 + FFN (activation='relu') + residual ----
    mu2 = jnp.mean(x1, axis=-1, keepdims=True)
    var2 = jnp.mean((x1 - mu2) ** 2, axis=-1, keepdims=True)
    x1n = (x1 - mu2) * lax.rsqrt(var2 + LN_EPS)
    x1n = x1n * ln2w_ref[...] + ln2b_ref[...]

    h1 = jnp.dot(x1n.astype(mxu_dtype), w1_ref[...],
                 preferred_element_type=jnp.float32) + b1_ref[...]
    h1 = jnp.maximum(h1, 0.0)
    x2 = x1 + (jnp.dot(h1.astype(mxu_dtype), w2_ref[...],
                       preferred_element_type=jnp.float32) + b2_ref[...])

    # ---- this layer's slice of the `reduce` Linear (accumulated outside) ----
    o_ref[...] = jnp.dot(x2.astype(mxu_dtype), wred_ref[...],
                         preferred_element_type=jnp.float32)


# --------------------------------------------------------------------------
# Pallas wrapper
# --------------------------------------------------------------------------
def _pick_block_windows(num_windows, win_tokens, *, max_block_tokens=256):
    """Windows per grid step: big blocks (amortize step overhead, fill MXU M),
    >= 2 steps when possible (v7x has 2 TensorCores), sublane-aligned blocks."""
    best_d, best_key = num_windows, None
    for d in range(1, num_windows + 1):
        if num_windows % d:
            continue
        tb = d * win_tokens
        if tb != num_windows * win_tokens and tb % 8:
            continue                     # block sublane dim must be a multiple of 8
        key = (num_windows // d >= 2, tb <= max_block_tokens, tb)
        if best_key is None or key > best_key:
            best_d, best_key = d, key
    return best_d


def encoder_layer_pallas(x_tokens, mask, p, wred_l, *, num_heads):
    """x_tokens: (T, C) tokens in window-major order; mask: (Tb, Tb)."""
    T, C = x_tokens.shape
    Tb = mask.shape[0]
    scale = (C // num_heads) ** (-0.5)        # head_dim ** -0.5 (qk_scale=None)
    kernel = functools.partial(_encoder_layer_kernel, num_heads=num_heads,
                               scale=scale, mxu_dtype=MXU_DTYPE)
    full = lambda i: (0, 0)
    to_mxu = lambda w: w.astype(MXU_DTYPE)    # bf16 MXU operands, halves weight DMA
    weights = [p["ln1_w"], p["ln1_b"], to_mxu(p["wqkv"]), p["bqkv"],
               to_mxu(p["wproj"]), p["bproj"], p["ln2_w"], p["ln2_b"],
               to_mxu(p["w1"]), p["b1"], to_mxu(p["w2"]), p["b2"], to_mxu(wred_l)]
    w_specs = [pl.BlockSpec(w.shape, full) for w in weights]

    return pl.pallas_call(
        kernel,
        out_shape=jax.ShapeDtypeStruct((T, C), jnp.float32),
        grid=(T // Tb,),
        in_specs=[pl.BlockSpec((Tb, C), lambda i: (i, 0)),
                  pl.BlockSpec(mask.shape, full)] + w_specs,
        out_specs=pl.BlockSpec((Tb, C), lambda i: (i, 0)),
        compiler_params=pltpu.CompilerParams(dimension_semantics=("parallel",)),
    )(x_tokens, mask, *weights)


# --------------------------------------------------------------------------
# Block forward (window partition / merge are thin layout glue)
# --------------------------------------------------------------------------
def block_forward(x, params, *, hidden_size, group_size_list, num_heads):
    L, B, C = x.shape
    H, W = hidden_size
    assert L == H * W, "input feature has wrong size"
    x_bhwc = jnp.transpose(x, (1, 0, 2)).reshape(B, H, W, C)

    acc = None
    for l, (p, G) in enumerate(zip(params["layers"], group_size_list)):
        N = G * G
        nw = B * (H // G) * (W // G)

        # --- window partition (every layer consumes the SAME input x) ---
        xg = x_bhwc.reshape(B, H // G, G, W // G, G, C)
        xg = jnp.transpose(xg, (0, 1, 3, 2, 4, 5)).reshape(nw * N, C)

        # --- trace-time-constant block-diagonal additive mask ---
        bw = _pick_block_windows(nw, N)
        Tb = bw * N
        wid = np.arange(Tb) // N
        mask = jnp.asarray(np.where(wid[:, None] == wid[None, :], 0.0, -1e30),
                           dtype=jnp.float32)

        # --- fused encoder layer + this layer's partial of the reduce matmul ---
        wred_l = params["reduce"]["w"][l * C:(l + 1) * C, :]
        part = encoder_layer_pallas(xg, mask, p, wred_l, num_heads=num_heads)

        # --- window merge of the partial (reduce is token-wise, so it commutes) ---
        part = part.reshape(B, H // G, W // G, G, G, C)
        part = jnp.transpose(part, (0, 1, 3, 2, 4, 5)).reshape(B, L, C)
        acc = part if acc is None else acc + part

    out = acc + params["reduce"]["b"]          # reduce bias added once
    return jnp.transpose(out, (1, 0, 2))       # back to (L, B, C)


# --------------------------------------------------------------------------
# Deterministic parameter init (shapes follow the PyTorch module's __init__;
# Linear weights stored pre-transposed as (in, out) so kernels do x @ W)
# --------------------------------------------------------------------------
def init_params(key, *, d_model, d_hidden, num_layers):
    C, Dh = d_model, d_hidden
    layers = []
    for _ in range(num_layers):
        key, k0, k1, k2, k3 = jax.random.split(key, 5)
        layers.append(dict(
            ln1_w=jnp.ones((1, C), jnp.float32),
            ln1_b=jnp.zeros((1, C), jnp.float32),
            wqkv=0.02 * jax.random.normal(k0, (C, 3 * C), jnp.float32),
            bqkv=jnp.zeros((1, 3 * C), jnp.float32),
            wproj=0.02 * jax.random.normal(k1, (C, C), jnp.float32),
            bproj=jnp.zeros((1, C), jnp.float32),
            ln2_w=jnp.ones((1, C), jnp.float32),
            ln2_b=jnp.zeros((1, C), jnp.float32),
            w1=0.02 * jax.random.normal(k2, (C, Dh), jnp.float32),
            b1=jnp.zeros((1, Dh), jnp.float32),
            w2=0.02 * jax.random.normal(k3, (Dh, C), jnp.float32),
            b2=jnp.zeros((1, C), jnp.float32),
        ))
    key, kr = jax.random.split(key)
    reduce = dict(
        w=0.02 * jax.random.normal(kr, (num_layers * C, C), jnp.float32),
        b=jnp.zeros((1, C), jnp.float32),
    )
    return dict(layers=layers, reduce=reduce)


# --------------------------------------------------------------------------
if __name__ == "__main__":
    H = W = 8                      # hidden_size = (8, 8)
    B = 2                          # batch
    C = 32                         # d_model
    Dh = 64                        # d_hidden (dim_feedforward)
    num_heads = 4
    group_size_list = (2, 4)       # two encoder layers with different windows
    L = H * W

    key = jax.random.PRNGKey(0)
    kx, kp = jax.random.split(key)
    x = jax.random.normal(kx, (L, B, C), jnp.float32)         # (hw, b, dim)
    params = init_params(kp, d_model=C, d_hidden=Dh,
                         num_layers=len(group_size_list))

    fwd = jax.jit(functools.partial(block_forward, hidden_size=(H, W),
                                    group_size_list=group_size_list,
                                    num_heads=num_heads))
    out = jax.block_until_ready(fwd(x, params))
    assert out.shape == (L, B, C), out.shape
    assert bool(jnp.all(jnp.isfinite(out)))
    print("KERNEL_OK")
</pallas_src>

<mosaic_0001>
module attributes {stable_mosaic.version = 11 : i64} {
  func.func @_encoder_layer_kernel(%arg0: i32, %arg1: memref<64x32xf32, #tpu.memory_space<vmem>>, %arg2: memref<64x64xf32, #tpu.memory_space<vmem>>, %arg3: memref<1x32xf32, #tpu.memory_space<vmem>>, %arg4: memref<1x32xf32, #tpu.memory_space<vmem>>, %arg5: memref<32x96xbf16, #tpu.memory_space<vmem>>, %arg6: memref<1x96xf32, #tpu.memory_space<vmem>>, %arg7: memref<32x32xbf16, #tpu.memory_space<vmem>>, %arg8: memref<1x32xf32, #tpu.memory_space<vmem>>, %arg9: memref<1x32xf32, #tpu.memory_space<vmem>>, %arg10: memref<1x32xf32, #tpu.memory_space<vmem>>, %arg11: memref<32x64xbf16, #tpu.memory_space<vmem>>, %arg12: memref<1x64xf32, #tpu.memory_space<vmem>>, %arg13: memref<64x32xbf16, #tpu.memory_space<vmem>>, %arg14: memref<1x32xf32, #tpu.memory_space<vmem>>, %arg15: memref<32x32xbf16, #tpu.memory_space<vmem>>, %arg16: memref<64x32xf32, #tpu.memory_space<vmem>>) attributes {dimension_semantics = [#tpu.dimension_semantics<parallel>], iteration_bounds = array<i64: 2>, scalar_prefetch = 0 : i64, scratch_operands = 0 : i64, tpu.core_type = #tpu.core_type<tc>, window_params = [{transform_indices = @transform_0, window_bounds = array<i64: 64, 32>}, {pipeline_mode = #tpu.pipeline_mode<synchronous>, transform_indices = @transform_1, window_bounds = array<i64: 64, 64>}, {pipeline_mode = #tpu.pipeline_mode<synchronous>, transform_indices = @transform_2, window_bounds = array<i64: 1, 32>}, {pipeline_mode = #tpu.pipeline_mode<synchronous>, transform_indices = @transform_3, window_bounds = array<i64: 1, 32>}, {pipeline_mode = #tpu.pipeline_mode<synchronous>, transform_indices = @transform_4, window_bounds = array<i64: 32, 96>}, {pipeline_mode = #tpu.pipeline_mode<synchronous>, transform_indices = @transform_5, window_bounds = array<i64: 1, 96>}, {pipeline_mode = #tpu.pipeline_mode<synchronous>, transform_indices = @transform_6, window_bounds = array<i64: 32, 32>}, {pipeline_mode = #tpu.pipeline_mode<synchronous>, transform_indices = @transform_7, window_bounds = array<i64: 1, 32>}, {pipeline_mode = #tpu.pipeline_mode<synchronous>, transform_indices = @transform_8, window_bounds = array<i64: 1, 32>}, {pipeline_mode = #tpu.pipeline_mode<synchronous>, transform_indices = @transform_9, window_bounds = array<i64: 1, 32>}, {pipeline_mode = #tpu.pipeline_mode<synchronous>, transform_indices = @transform_10, window_bounds = array<i64: 32, 64>}, {pipeline_mode = #tpu.pipeline_mode<synchronous>, transform_indices = @transform_11, window_bounds = array<i64: 1, 64>}, {pipeline_mode = #tpu.pipeline_mode<synchronous>, transform_indices = @transform_12, window_bounds = array<i64: 64, 32>}, {pipeline_mode = #tpu.pipeline_mode<synchronous>, transform_indices = @transform_13, window_bounds = array<i64: 1, 32>}, {pipeline_mode = #tpu.pipeline_mode<synchronous>, transform_indices = @transform_14, window_bounds = array<i64: 32, 32>}, {transform_indices = @transform_15, window_bounds = array<i64: 64, 32>}]} {
    %c0 = arith.constant 0 : index
    %c0_0 = arith.constant 0 : index
    %0 = vector.load %arg1[%c0, %c0_0] : memref<64x32xf32, #tpu.memory_space<vmem>>, vector<64x32xf32>
    %cst = arith.constant dense<0.000000e+00> : vector<64xf32>
    %1 = vector.multi_reduction <add>, %0, %cst [1] : vector<64x32xf32> to vector<64xf32>
    %2 = vector.shape_cast %1 : vector<64xf32> to vector<64x1xf32>
    %cst_1 = arith.constant 3.200000e+01 : f32
    %3 = vector.broadcast %cst_1 : f32 to vector<64x1xf32>
    %4 = arith.divf %2, %3 : vector<64x1xf32>
    %5 = vector.broadcast %4 : vector<64x1xf32> to vector<64x32xf32>
    %6 = arith.subf %0, %5 : vector<64x32xf32>
    %7 = arith.mulf %6, %6 : vector<64x32xf32>
    %cst_2 = arith.constant dense<0.000000e+00> : vector<64xf32>
    %8 = vector.multi_reduction <add>, %7, %cst_2 [1] : vector<64x32xf32> to vector<64xf32>
    %9 = vector.shape_cast %8 : vector<64xf32> to vector<64x1xf32>
    %cst_3 = arith.constant 3.200000e+01 : f32
    %10 = vector.broadcast %cst_3 : f32 to vector<64x1xf32>
    %11 = arith.divf %9, %10 : vector<64x1xf32>
    %12 = vector.broadcast %4 : vector<64x1xf32> to vector<64x32xf32>
    %13 = arith.subf %0, %12 : vector<64x32xf32>
    %cst_4 = arith.constant 9.99999974E-6 : f32
    %14 = vector.broadcast %cst_4 : f32 to vector<64x1xf32>
    %15 = arith.addf %11, %14 : vector<64x1xf32>
    %16 = math.rsqrt %15 : vector<64x1xf32>
    %17 = vector.broadcast %16 : vector<64x1xf32> to vector<64x32xf32>
    %18 = arith.mulf %13, %17 : vector<64x32xf32>
    %c0_5 = arith.constant 0 : index
    %c0_6 = arith.constant 0 : index
    %19 = vector.load %arg3[%c0_5, %c0_6] : memref<1x32xf32, #tpu.memory_space<vmem>>, vector<1x32xf32>
    %20 = vector.broadcast %19 : vector<1x32xf32> to vector<64x32xf32>
    %21 = arith.mulf %18, %20 : vector<64x32xf32>
    %c0_7 = arith.constant 0 : index
    %c0_8 = arith.constant 0 : index
    %22 = vector.load %arg4[%c0_7, %c0_8] : memref<1x32xf32, #tpu.memory_space<vmem>>, vector<1x32xf32>
    %23 = vector.broadcast %22 : vector<1x32xf32> to vector<64x32xf32>
    %24 = arith.addf %21, %23 : vector<64x32xf32>
    %25 = arith.truncf %24 : vector<64x32xf32> to vector<64x32xbf16>
    %c0_9 = arith.constant 0 : index
    %c0_10 = arith.constant 0 : index
    %26 = vector.load %arg5[%c0_9, %c0_10] : memref<32x96xbf16, #tpu.memory_space<vmem>>, vector<32x96xbf16>
    %cst_11 = arith.constant dense<0.000000e+00> : vector<64x96xf32>
    %27 = tpu.matmul %25, %26, %cst_11 {dimension_numbers = #tpu.dot_dimension_numbers<[1], [0], [0], [1], [0, 0, 1, 1], [], []>} : vector<64x32xbf16>, vector<32x96xbf16>, vector<64x96xf32> -> vector<64x96xf32>
    %c0_12 = arith.constant 0 : index
    %c0_13 = arith.constant 0 : index
    %28 = vector.load %arg6[%c0_12, %c0_13] : memref<1x96xf32, #tpu.memory_space<vmem>>, vector<1x96xf32>
    %29 = vector.broadcast %28 : vector<1x96xf32> to vector<64x96xf32>
    %30 = arith.addf %27, %29 : vector<64x96xf32>
    %c0_14 = arith.constant 0 : index
    %c0_15 = arith.constant 0 : index
    %31 = vector.load %arg2[%c0_14, %c0_15] : memref<64x64xf32, #tpu.memory_space<vmem>>, vector<64x64xf32>
    %32 = vector.extract_strided_slice %30 {offsets = [0, 0], sizes = [64, 8], strides = [1, 1]} : vector<64x96xf32> to vector<64x8xf32>
    %cst_16 = arith.constant 0.353553385 : f32
    %33 = vector.broadcast %cst_16 : f32 to vector<64x8xf32>
    %34 = arith.mulf %32, %33 : vector<64x8xf32>
    %35 = arith.truncf %34 : vector<64x8xf32> to vector<64x8xbf16>
    %36 = vector.extract_strided_slice %30 {offsets = [0, 32], sizes = [64, 8], strides = [1, 1]} : vector<64x96xf32> to vector<64x8xf32>
    %37 = arith.truncf %36 : vector<64x8xf32> to vector<64x8xbf16>
    %38 = vector.extract_strided_slice %30 {offsets = [0, 64], sizes = [64, 8], strides = [1, 1]} : vector<64x96xf32> to vector<64x8xf32>
    %39 = arith.truncf %38 : vector<64x8xf32> to vector<64x8xbf16>
    %cst_17 = arith.constant dense<0.000000e+00> : vector<64x64xf32>
    %40 = tpu.matmul %35, %37, %cst_17 {dimension_numbers = #tpu.dot_dimension_numbers<[1], [1], [0], [0], [0, 0, 1, 0], [], []>} : vector<64x8xbf16>, vector<64x8xbf16>, vector<64x64xf32> -> vector<64x64xf32>
    %41 = arith.addf %40, %31 : vector<64x64xf32>
    %cst_18 = arith.constant dense<0xFF800000> : vector<64xf32>
    %42 = vector.multi_reduction <maximumf>, %41, %cst_18 [1] : vector<64x64xf32> to vector<64xf32>
    %43 = vector.shape_cast %42 : vector<64xf32> to vector<64x1xf32>
    %44 = vector.broadcast %43 : vector<64x1xf32> to vector<64x64xf32>
    %45 = arith.subf %41, %44 : vector<64x64xf32>
    %46 = math.exp %45 : vector<64x64xf32>
    %cst_19 = arith.constant dense<0.000000e+00> : vector<64xf32>
    %47 = vector.multi_reduction <add>, %46, %cst_19 [1] : vector<64x64xf32> to vector<64xf32>
    %48 = vector.shape_cast %47 : vector<64xf32> to vector<64x1xf32>
    %49 = tpu.reciprocal %48 {approx = true} : vector<64x1xf32> -> vector<64x1xf32>
    %50 = vector.broadcast %49 : vector<64x1xf32> to vector<64x64xf32>
    %51 = arith.mulf %46, %50 : vector<64x64xf32>
    %52 = arith.truncf %51 : vector<64x64xf32> to vector<64x64xbf16>
    %cst_20 = arith.constant dense<0.000000e+00> : vector<64x8xf32>
    %53 = tpu.matmul %52, %39, %cst_20 {dimension_numbers = #tpu.dot_dimension_numbers<[1], [0], [0], [1], [0, 0, 1, 1], [], []>} : vector<64x64xbf16>, vector<64x8xbf16>, vector<64x8xf32> -> vector<64x8xf32>
    %54 = vector.extract_strided_slice %30 {offsets = [0, 8], sizes = [64, 8], strides = [1, 1]} : vector<64x96xf32> to vector<64x8xf32>
    %cst_21 = arith.constant 0.353553385 : f32
    %55 = vector.broadcast %cst_21 : f32 to vector<64x8xf32>
    %56 = arith.mulf %54, %55 : vector<64x8xf32>
    %57 = arith.truncf %56 : vector<64x8xf32> to vector<64x8xbf16>
    %58 = vector.extract_strided_slice %30 {offsets = [0, 40], sizes = [64, 8], strides = [1, 1]} : vector<64x96xf32> to vector<64x8xf32>
    %59 = arith.truncf %58 : vector<64x8xf32> to vector<64x8xbf16>
    %60 = vector.extract_strided_slice %30 {offsets = [0, 72], sizes = [64, 8], strides = [1, 1]} : vector<64x96xf32> to vector<64x8xf32>
    %61 = arith.truncf %60 : vector<64x8xf32> to vector<64x8xbf16>
    %cst_22 = arith.constant dense<0.000000e+00> : vector<64x64xf32>
    %62 = tpu.matmul %57, %59, %cst_22 {dimension_numbers = #tpu.dot_dimension_numbers<[1], [1], [0], [0], [0, 0, 1, 0], [], []>} : vector<64x8xbf16>, vector<64x8xbf16>, vector<64x64xf32> -> vector<64x64xf32>
    %63 = arith.addf %62, %31 : vector<64x64xf32>
    %cst_23 = arith.constant dense<0xFF800000> : vector<64xf32>
    %64 = vector.multi_reduction <maximumf>, %63, %cst_23 [1] : vector<64x64xf32> to vector<64xf32>
    %65 = vector.shape_cast %64 : vector<64xf32> to vector<64x1xf32>
    %66 = vector.broadcast %65 : vector<64x1xf32> to vector<64x64xf32>
    %67 = arith.subf %63, %66 : vector<64x64xf32>
    %68 = math.exp %67 : vector<64x64xf32>
    %cst_24 = arith.constant dense<0.000000e+00> : vector<64xf32>
    %69 = vector.multi_reduction <add>, %68, %cst_24 [1] : vector<64x64xf32> to vector<64xf32>
    %70 = vector.shape_cast %69 : vector<64xf32> to vector<64x1xf32>
    %71 = tpu.reciprocal %70 {approx = true} : vector<64x1xf32> -> vector<64x1xf32>
    %72 = vector.broadcast %71 : vector<64x1xf32> to vector<64x64xf32>
    %73 = arith.mulf %68, %72 : vector<64x64xf32>
    %74 = arith.truncf %73 : vector<64x64xf32> to vector<64x64xbf16>
    %cst_25 = arith.constant dense<0.000000e+00> : vector<64x8xf32>
    %75 = tpu.matmul %74, %61, %cst_25 {dimension_numbers = #tpu.dot_dimension_numbers<[1], [0], [0], [1], [0, 0, 1, 1], [], []>} : vector<64x64xbf16>, vector<64x8xbf16>, vector<64x8xf32> -> vector<64x8xf32>
    %76 = vector.extract_strided_slice %30 {offsets = [0, 16], sizes = [64, 8], strides = [1, 1]} : vector<64x96xf32> to vector<64x8xf32>
    %cst_26 = arith.constant 0.353553385 : f32
    %77 = vector.broadcast %cst_26 : f32 to vector<64x8xf32>
    %78 = arith.mulf %76, %77 : vector<64x8xf32>
    %79 = arith.truncf %78 : vector<64x8xf32> to vector<64x8xbf16>
    %80 = vector.extract_strided_slice %30 {offsets = [0, 48], sizes = [64, 8], strides = [1, 1]} : vector<64x96xf32> to vector<64x8xf32>
    %81 = arith.truncf %80 : vector<64x8xf32> to vector<64x8xbf16>
    %82 = vector.extract_strided_slice %30 {offsets = [0, 80], sizes = [64, 8], strides = [1, 1]} : vector<64x96xf32> to vector<64x8xf32>
    %83 = arith.truncf %82 : vector<64x8xf32> to vector<64x8xbf16>
    %cst_27 = arith.constant dense<0.000000e+00> : vector<64x64xf32>
    %84 = tpu.matmul %79, %81, %cst_27 {dimension_numbers = #tpu.dot_dimension_numbers<[1], [1], [0], [0], [0, 0, 1, 0], [], []>} : vector<64x8xbf16>, vector<64x8xbf16>, vector<64x64xf32> -> vector<64x64xf32>
    %85 = arith.addf %84, %31 : vector<64x64xf32>
    %cst_28 = arith.constant dense<0xFF800000> : vector<64xf32>
    %86 = vector.multi_reduction <maximumf>, %85, %cst_28 [1] : vector<64x64xf32> to vector<64xf32>
    %87 = vector.shape_cast %86 : vector<64xf32> to vector<64x1xf32>
    %88 = vector.broadcast %87 : vector<64x1xf32> to vector<64x64xf32>
    %89 = arith.subf %85, %88 : vector<64x64xf32>
    %90 = math.exp %89 : vector<64x64xf32>
    %cst_29 = arith.constant dense<0.000000e+00> : vector<64xf32>
    %91 = vector.multi_reduction <add>, %90, %cst_29 [1] : vector<64x64xf32> to vector<64xf32>
    %92 = vector.shape_cast %91 : vector<64xf32> to vector<64x1xf32>
    %93 = tpu.reciprocal %92 {approx = true} : vector<64x1xf32> -> vector<64x1xf32>
    %94 = vector.broadcast %93 : vector<64x1xf32> to vector<64x64xf32>
    %95 = arith.mulf %90, %94 : vector<64x64xf32>
    %96 = arith.truncf %95 : vector<64x64xf32> to vector<64x64xbf16>
    %cst_30 = arith.constant dense<0.000000e+00> : vector<64x8xf32>
    %97 = tpu.matmul %96, %83, %cst_30 {dimension_numbers = #tpu.dot_dimension_numbers<[1], [0], [0], [1], [0, 0, 1, 1], [], []>} : vector<64x64xbf16>, vector<64x8xbf16>, vector<64x8xf32> -> vector<64x8xf32>
    %98 = vector.extract_strided_slice %30 {offsets = [0, 24], sizes = [64, 8], strides = [1, 1]} : vector<64x96xf32> to vector<64x8xf32>
    %cst_31 = arith.constant 0.353553385 : f32
    %99 = vector.broadcast %cst_31 : f32 to vector<64x8xf32>
    %100 = arith.mulf %98, %99 : vector<64x8xf32>
    %101 = arith.truncf %100 : vector<64x8xf32> to vector<64x8xbf16>
    %102 = vector.extract_strided_slice %30 {offsets = [0, 56], sizes = [64, 8], strides = [1, 1]} : vector<64x96xf32> to vector<64x8xf32>
    %103 = arith.truncf %102 : vector<64x8xf32> to vector<64x8xbf16>
    %104 = vector.extract_strided_slice %30 {offsets = [0, 88], sizes = [64, 8], strides = [1, 1]} : vector<64x96xf32> to vector<64x8xf32>
    %105 = arith.truncf %104 : vector<64x8xf32> to vector<64x8xbf16>
    %cst_32 = arith.constant dense<0.000000e+00> : vector<64x64xf32>
    %106 = tpu.matmul %101, %103, %cst_32 {dimension_numbers = #tpu.dot_dimension_numbers<[1], [1], [0], [0], [0, 0, 1, 0], [], []>} : vector<64x8xbf16>, vector<64x8xbf16>, vector<64x64xf32> -> vector<64x64xf32>
    %107 = arith.addf %106, %31 : vector<64x64xf32>
    %cst_33 = arith.constant dense<0xFF800000> : vector<64xf32>
    %108 = vector.multi_reduction <maximumf>, %107, %cst_33 [1] : vector<64x64xf32> to vector<64xf32>
    %109 = vector.shape_cast %108 : vector<64xf32> to vector<64x1xf32>
    %110 = vector.broadcast %109 : vector<64x1xf32> to vector<64x64xf32>
    %111 = arith.subf %107, %110 : vector<64x64xf32>
    %112 = math.exp %111 : vector<64x64xf32>
    %cst_34 = arith.constant dense<0.000000e+00> : vector<64xf32>
    %113 = vector.multi_reduction <add>, %112, %cst_34 [1] : vector<64x64xf32> to vector<64xf32>
    %114 = vector.shape_cast %113 : vector<64xf32> to vector<64x1xf32>
    %115 = tpu.reciprocal %114 {approx = true} : vector<64x1xf32> -> vector<64x1xf32>
    %116 = vector.broadcast %115 : vector<64x1xf32> to vector<64x64xf32>
    %117 = arith.mulf %112, %116 : vector<64x64xf32>
    %118 = arith.truncf %117 : vector<64x64xf32> to vector<64x64xbf16>
    %cst_35 = arith.constant dense<0.000000e+00> : vector<64x8xf32>
    %119 = tpu.matmul %118, %105, %cst_35 {dimension_numbers = #tpu.dot_dimension_numbers<[1], [0], [0], [1], [0, 0, 1, 1], [], []>} : vector<64x64xbf16>, vector<64x8xbf16>, vector<64x8xf32> -> vector<64x8xf32>
    %120 = tpu.concatenate %53, %75, %97, %119 in 1 : vector<64x8xf32>, vector<64x8xf32>, vector<64x8xf32>, vector<64x8xf32> -> vector<64x32xf32>
    %121 = arith.truncf %120 : vector<64x32xf32> to vector<64x32xbf16>
    %c0_36 = arith.constant 0 : index
    %c0_37 = arith.constant 0 : index
    %122 = vector.load %arg7[%c0_36, %c0_37] : memref<32x32xbf16, #tpu.memory_space<vmem>>, vector<32x32xbf16>
    %cst_38 = arith.constant dense<0.000000e+00> : vector<64x32xf32>
    %123 = tpu.matmul %121, %122, %cst_38 {dimension_numbers = #tpu.dot_dimension_numbers<[1], [0], [0], [1], [0, 0, 1, 1], [], []>} : vector<64x32xbf16>, vector<32x32xbf16>, vector<64x32xf32> -> vector<64x32xf32>
    %c0_39 = arith.constant 0 : index
    %c0_40 = arith.constant 0 : index
    %124 = vector.load %arg8[%c0_39, %c0_40] : memref<1x32xf32, #tpu.memory_space<vmem>>, vector<1x32xf32>
    %125 = vector.broadcast %124 : vector<1x32xf32> to vector<64x32xf32>
    %126 = arith.addf %123, %125 : vector<64x32xf32>
    %127 = arith.addf %0, %126 : vector<64x32xf32>
    %cst_41 = arith.constant dense<0.000000e+00> : vector<64xf32>
    %128 = vector.multi_reduction <add>, %127, %cst_41 [1] : vector<64x32xf32> to vector<64xf32>
    %129 = vector.shape_cast %128 : vector<64xf32> to vector<64x1xf32>
    %cst_42 = arith.constant 3.200000e+01 : f32
    %130 = vector.broadcast %cst_42 : f32 to vector<64x1xf32>
    %131 = arith.divf %129, %130 : vector<64x1xf32>
    %132 = vector.broadcast %131 : vector<64x1xf32> to vector<64x32xf32>
    %133 = arith.subf %127, %132 : vector<64x32xf32>
    %134 = arith.mulf %133, %133 : vector<64x32xf32>
    %cst_43 = arith.constant dense<0.000000e+00> : vector<64xf32>
    %135 = vector.multi_reduction <add>, %134, %cst_43 [1] : vector<64x32xf32> to vector<64xf32>
    %136 = vector.shape_cast %135 : vector<64xf32> to vector<64x1xf32>
    %cst_44 = arith.constant 3.200000e+01 : f32
    %137 = vector.broadcast %cst_44 : f32 to vector<64x1xf32>
    %138 = arith.divf %136, %137 : vector<64x1xf32>
    %139 = vector.broadcast %131 : vector<64x1xf32> to vector<64x32xf32>
    %140 = arith.subf %127, %139 : vector<64x32xf32>
    %cst_45 = arith.constant 9.99999974E-6 : f32
    %141 = vector.broadcast %cst_45 : f32 to vector<64x1xf32>
    %142 = arith.addf %138, %141 : vector<64x1xf32>
    %143 = math.rsqrt %142 : vector<64x1xf32>
    %144 = vector.broadcast %143 : vector<64x1xf32> to vector<64x32xf32>
    %145 = arith.mulf %140, %144 : vector<64x32xf32>
    %c0_46 = arith.constant 0 : index
    %c0_47 = arith.constant 0 : index
    %146 = vector.load %arg9[%c0_46, %c0_47] : memref<1x32xf32, #tpu.memory_space<vmem>>, vector<1x32xf32>
    %147 = vector.broadcast %146 : vector<1x32xf32> to vector<64x32xf32>
    %148 = arith.mulf %145, %147 : vector<64x32xf32>
    %c0_48 = arith.constant 0 : index
    %c0_49 = arith.constant 0 : index
    %149 = vector.load %arg10[%c0_48, %c0_49] : memref<1x32xf32, #tpu.memory_space<vmem>>, vector<1x32xf32>
    %150 = vector.broadcast %149 : vector<1x32xf32> to vector<64x32xf32>
    %151 = arith.addf %148, %150 : vector<64x32xf32>
    %152 = arith.truncf %151 : vector<64x32xf32> to vector<64x32xbf16>
    %c0_50 = arith.constant 0 : index
    %c0_51 = arith.constant 0 : index
    %153 = vector.load %arg11[%c0_50, %c0_51] : memref<32x64xbf16, #tpu.memory_space<vmem>>, vector<32x64xbf16>
    %cst_52 = arith.constant dense<0.000000e+00> : vector<64x64xf32>
    %154 = tpu.matmul %152, %153, %cst_52 {dimension_numbers = #tpu.dot_dimension_numbers<[1], [0], [0], [1], [0, 0, 1, 1], [], []>} : vector<64x32xbf16>, vector<32x64xbf16>, vector<64x64xf32> -> vector<64x64xf32>
    %c0_53 = arith.constant 0 : index
    %c0_54 = arith.constant 0 : index
    %155 = vector.load %arg12[%c0_53, %c0_54] : memref<1x64xf32, #tpu.memory_space<vmem>>, vector<1x64xf32>
    %156 = vector.broadcast %155 : vector<1x64xf32> to vector<64x64xf32>
    %157 = arith.addf %154, %156 : vector<64x64xf32>
    %cst_55 = arith.constant 0.000000e+00 : f32
    %158 = vector.broadcast %cst_55 : f32 to vector<64x64xf32>
    %159 = arith.maximumf %157, %158 : vector<64x64xf32>
    %160 = arith.truncf %159 : vector<64x64xf32> to vector<64x64xbf16>
    %c0_56 = arith.constant 0 : index
    %c0_57 = arith.constant 0 : index
    %161 = vector.load %arg13[%c0_56, %c0_57] : memref<64x32xbf16, #tpu.memory_space<vmem>>, vector<64x32xbf16>
    %cst_58 = arith.constant dense<0.000000e+00> : vector<64x32xf32>
    %162 = tpu.matmul %160, %161, %cst_58 {dimension_numbers = #tpu.dot_dimension_numbers<[1], [0], [0], [1], [0, 0, 1, 1], [], []>} : vector<64x64xbf16>, vector<64x32xbf16>, vector<64x32xf32> -> vector<64x32xf32>
    %c0_59 = arith.constant 0 : index
    %c0_60 = arith.constant 0 : index
    %163 = vector.load %arg14[%c0_59, %c0_60] : memref<1x32xf32, #tpu.memory_space<vmem>>, vector<1x32xf32>
    %164 = vector.broadcast %163 : vector<1x32xf32> to vector<64x32xf32>
    %165 = arith.addf %162, %164 : vector<64x32xf32>
    %166 = arith.addf %127, %165 : vector<64x32xf32>
    %167 = arith.truncf %166 : vector<64x32xf32> to vector<64x32xbf16>
    %c0_61 = arith.constant 0 : index
    %c0_62 = arith.constant 0 : index
    %168 = vector.load %arg15[%c0_61, %c0_62] : memref<32x32xbf16, #tpu.memory_space<vmem>>, vector<32x32xbf16>
    %cst_63 = arith.constant dense<0.000000e+00> : vector<64x32xf32>
    %169 = tpu.matmul %167, %168, %cst_63 {dimension_numbers = #tpu.dot_dimension_numbers<[1], [0], [0], [1], [0, 0, 1, 1], [], []>} : vector<64x32xbf16>, vector<32x32xbf16>, vector<64x32xf32> -> vector<64x32xf32>
    %c0_64 = arith.constant 0 : index
    %c0_65 = arith.constant 0 : index
    %170 = vector.load %arg16[%c0_64, %c0_65] : memref<64x32xf32, #tpu.memory_space<vmem>>, vector<64x32xf32>
    tpu.vector_store %arg16[%c0_64, %c0_65], %169 {strides = array<i32>} : memref<64x32xf32, #tpu.memory_space<vmem>>, vector<64x32xf32>,
    return
  }
  func.func @transform_0(%arg0: i32) -> (i32, i32) {
    %c0_i32 = arith.constant 0 : i32
    %c0_i32_0 = arith.constant 0 : i32
    return %arg0, %c0_i32 : i32, i32
  }
  func.func @transform_1(%arg0: i32) -> (i32, i32) {
    %c0_i32 = arith.constant 0 : i32
    %c0_i32_0 = arith.constant 0 : i32
    %c0_i32_1 = arith.constant 0 : i32
    return %c0_i32, %c0_i32_0 : i32, i32
  }
  func.func @transform_2(%arg0: i32) -> (i32, i32) {
    %c0_i32 = arith.constant 0 : i32
    %c0_i32_0 = arith.constant 0 : i32
    %c0_i32_1 = arith.constant 0 : i32
    return %c0_i32, %c0_i32_0 : i32, i32
  }
  func.func @transform_3(%arg0: i32) -> (i32, i32) {
    %c0_i32 = arith.constant 0 : i32
    %c0_i32_0 = arith.constant 0 : i32
    %c0_i32_1 = arith.constant 0 : i32
    return %c0_i32, %c0_i32_0 : i32, i32
  }
  func.func @transform_4(%arg0: i32) -> (i32, i32) {
    %c0_i32 = arith.constant 0 : i32
    %c0_i32_0 = arith.constant 0 : i32
    %c0_i32_1 = arith.constant 0 : i32
    return %c0_i32, %c0_i32_0 : i32, i32
  }
  func.func @transform_5(%arg0: i32) -> (i32, i32) {
    %c0_i32 = arith.constant 0 : i32
    %c0_i32_0 = arith.constant 0 : i32
    %c0_i32_1 = arith.constant 0 : i32
    return %c0_i32, %c0_i32_0 : i32, i32
  }
  func.func @transform_6(%arg0: i32) -> (i32, i32) {
    %c0_i32 = arith.constant 0 : i32
    %c0_i32_0 = arith.constant 0 : i32
    %c0_i32_1 = arith.constant 0 : i32
    return %c0_i32, %c0_i32_0 : i32, i32
  }
  func.func @transform_7(%arg0: i32) -> (i32, i32) {
    %c0_i32 = arith.constant 0 : i32
    %c0_i32_0 = arith.constant 0 : i32
    %c0_i32_1 = arith.constant 0 : i32
    return %c0_i32, %c0_i32_0 : i32, i32
  }
  func.func @transform_8(%arg0: i32) -> (i32, i32) {
    %c0_i32 = arith.constant 0 : i32
    %c0_i32_0 = arith.constant 0 : i32
    %c0_i32_1 = arith.constant 0 : i32
    return %c0_i32, %c0_i32_0 : i32, i32
  }
  func.func @transform_9(%arg0: i32) -> (i32, i32) {
    %c0_i32 = arith.constant 0 : i32
    %c0_i32_0 = arith.constant 0 : i32
    %c0_i32_1 = arith.constant 0 : i32
    return %c0_i32, %c0_i32_0 : i32, i32
  }
  func.func @transform_10(%arg0: i32) -> (i32, i32) {
    %c0_i32 = arith.constant 0 : i32
    %c0_i32_0 = arith.constant 0 : i32
    %c0_i32_1 = arith.constant 0 : i32
    return %c0_i32, %c0_i32_0 : i32, i32
  }
  func.func @transform_11(%arg0: i32) -> (i32, i32) {
    %c0_i32 = arith.constant 0 : i32
    %c0_i32_0 = arith.constant 0 : i32
    %c0_i32_1 = arith.constant 0 : i32
    return %c0_i32, %c0_i32_0 : i32, i32
  }
  func.func @transform_12(%arg0: i32) -> (i32, i32) {
    %c0_i32 = arith.constant 0 : i32
    %c0_i32_0 = arith.constant 0 : i32
    %c0_i32_1 = arith.constant 0 : i32
    return %c0_i32, %c0_i32_0 : i32, i32
  }
  func.func @transform_13(%arg0: i32) -> (i32, i32) {
    %c0_i32 = arith.constant 0 : i32
    %c0_i32_0 = arith.constant 0 : i32
    %c0_i32_1 = arith.constant 0 : i32
    return %c0_i32, %c0_i32_0 : i32, i32
  }
  func.func @transform_14(%arg0: i32) -> (i32, i32) {
    %c0_i32 = arith.constant 0 : i32
    %c0_i32_0 = arith.constant 0 : i32
    %c0_i32_1 = arith.constant 0 : i32
    return %c0_i32, %c0_i32_0 : i32, i32
  }
  func.func @transform_15(%arg0: i32) -> (i32, i32) {
    %c0_i32 = arith.constant 0 : i32
    %c0_i32_0 = arith.constant 0 : i32
    return %arg0, %c0_i32 : i32, i32
  }
}

</mosaic_0001>

<bundles_post_ra>
// kernel: block_forward.3
= control target key start
LH: loop header
LB: loop body
LE: loop exit
PB: predicated region body
PF: predicated region fallthrough
CT: control target
= control target key end

     0   :  { %s3445_s18 = smov 0   ;;  %s4227_s0 = inlined_call_operand.vmem [shape: f32[128,32], index: 0, kind: input, shape index: {}]   ;;  %s4228_s1 = inlined_call_operand.vmem [shape: f32[64,64], index: 1, kind: input, shape index: {}]   ;;  %s4229_s2 = inlined_call_operand.vmem [shape: f32[1,32], index: 2, kind: input, shape index: {}]   ;;  %s4230_s3 = inlined_call_operand.vmem [shape: f32[1,32], index: 3, kind: input, shape index: {}]   ;;  %s4231_s4 = inlined_call_operand.vmem [shape: bf16[32,96], index: 4, kind: input, shape index: {}]   ;;  %s4232_s5 = inlined_call_operand.vmem [shape: f32[1,96], index: 5, kind: input, shape index: {}]   ;;  %s4233_s6 = inlined_call_operand.vmem [shape: bf16[32,32], index: 6, kind: input, shape index: {}]   ;;  %s4234_s7 = inlined_call_operand.vmem [shape: f32[1,32], index: 7, kind: input, shape index: {}]   ;;  %s4235_s8 = inlined_call_operand.vmem [shape: f32[1,32], index: 8, kind: input, shape index: {}]   ;;  %s4236_s9 = inlined_call_operand.vmem [shape: f32[1,32], index: 9, kind: input, shape index: {}]   ;;  %s4237_s10 = inlined_call_operand.vmem [shape: bf16[32,64], index: 10, kind: input, shape index: {}]   ;;  %s4238_s11 = inlined_call_operand.vmem [shape: f32[1,64], index: 11, kind: input, shape index: {}]   ;;  %s4239_s12 = inlined_call_operand.vmem [shape: bf16[64,32], index: 12, kind: input, shape index: {}]   ;;  %s4240_s13 = inlined_call_operand.vmem [shape: f32[1,32], index: 13, kind: input, shape index: {}]   ;;  %s4241_s14 = inlined_call_operand.vmem [shape: bf16[32,32], index: 14, kind: input, shape index: {}]   ;;  %s4242_s15 = inlined_call_operand.vmem [shape: f32[128,32], index: 15, kind: output, shape index: {}]  }
   0x1 LB: > { %s2686_s19 = sadd.s32 4294967295, %s3349_s18   ;;  %p2690_p0 = scmp.ge.s32.totalorder %s3349_s18, 1  ;;  %s3349_s18 = sphi %s3445_s18, %s25_s18  }
   0x2   : > { %p438_p1 = scmp.lt.s32.totalorder %s3349_s18, 3 }
   0x4   : > { %p439_p2 = pnand %p2690_p0, %p438_p1 }
   0x5   : > { %s2691_s20 = sshll.u32 (!%p439_p2), %s2686_s19, 3  ;;  %vm507_vm0 = vcmask (!%p439_p2), 261120   ;;  %v3155_v56 = vld [vmem:[%s4231_s4] sm:$0xff] (!%p439_p2)   ;;  %v3156_v57 = vld [vmem:[%s4231_s4 + $0x8] sm:$0xff] (!%p439_p2)   ;;  %s3351_s23 = smov (!%p439_p2), 96   ;;  %vm783_vm1 = vcmask (!%p439_p2), 64512  }
   0x6   : > { %442 = sbr.rel (%p439_p2) target bundleno = 4683 (0x124b), region = 80  ;;  %p487_p3 = scmp.lt.s32.totalorder (!%p439_p2), %s2691_s20, 15  ;;  %2865 = vmatprep.subr.bf16.mxu0 (!%p439_p2), %v3155_v56  ;;  %vm873_vm2 = vcmask (!%p439_p2), 523264   ;;  %vm2021_vm3 = vcmask (!%p439_p2), 130048   ;;  %vm2030_vm4 = vcmask (!%p439_p2), 195584  }
   0x7   : > { %2866 = vmatpush3.bf16.msra.mxu0 (!%p439_p2), %v3155_v56  ;;  %s3352_s26 = smov (!%p439_p2), 64   ;;  %s3353_s16 = smov (!%p439_p2), 88  }
   0x8   : > { %2867 = vmatprep.subr.bf16.mxu0 (!%p439_p2), %v3156_v57  ;;  %s3354_s17 = smov (!%p439_p2), 120   ;;  %s3355_s19 = smov (!%p439_p2), 56  }
   0x9   : > { %s3356_s22 = smov (!%p439_p2), 80   ;;  %s3358_s25 = smov (!%p439_p2), 48  }
   0xa   : > { %s3360_s27 = smov (!%p439_p2), 104   ;;  %s3364_s29 = smov (!%p439_p2), 24  }
   0xb   : > { %2868 = vmatpush3.bf16.msra.mxu0 (!%p439_p2), %v3156_v57 }
   0xd   : > { %s4244_s20 = smov (!%p487_p3, %s2691_s20), 15 }
   0xe   : > { %s2692_s21 = sshll.u32 %s4244_s20, 3 }
   0xf   : > { %s3461_s24 = scalar_lea.vmem %s4227_s0, %s2692_s21 }
  0x10   : > { %v499_v0 = vld [vmem:[%s3461_s24] sm:$0xff]  ;;  %v501_v1 = vld [vmem:[%s3461_s24 + $0x10] sm:$0xff]  ;;  %v500_v2 = vld [vmem:[%s3461_s24 + $0x8] sm:$0xff] }
  0x11   : > { %v508_v3 = vsel %vm507_vm0, %v499_v0, 0.0  ;;  %v514_v4 = vsel %vm507_vm0, %v501_v1, 0.0  ;;  %v502_v5 = vld [vmem:[%s3461_s24 + $0x18] sm:$0xff]  ;;  %v511_v6 = vsel %vm507_vm0, %v500_v2, 0.0  ;;  %v503_v7 = vld [vmem:[%s3461_s24 + $0x20] sm:$0xff]  ;;  %v504_v9 = vld [vmem:[%s3461_s24 + $0x28] sm:$0xff] }
  0x12   : > { %509 = vadd.xlane.f32.xlu0 %v508_v3  ;;  %515 = vadd.xlane.f32.xlu1 %v514_v4  ;;  %v517_v8 = vsel %vm507_vm0, %v502_v5, 0.0  ;;  %v520_v10 = vsel %vm507_vm0, %v503_v7, 0.0  ;;  %v523_v11 = vsel %vm507_vm0, %v504_v9, 0.0  ;;  %v505_v12 = vld [vmem:[%s3461_s24 + $0x30] sm:$0xff]  ;;  %v506_v13 = vld [vmem:[%s3461_s24 + $0x38] sm:$0xff] }
  0x13   : > { %v526_v14 = vsel %vm507_vm0, %v505_v12, 0.0  ;;  %v529_v15 = vsel %vm507_vm0, %v506_v13, 0.0 }
  0x16   : > { %512 = vadd.xlane.f32.xlu0 %v511_v6  ;;  %518 = vadd.xlane.f32.xlu1 %v517_v8 }
  0x1a   : > { %521 = vadd.xlane.f32.xlu0 %v520_v10  ;;  %524 = vadd.xlane.f32.xlu1 %v523_v11 }
  0x1e   : > { %527 = vadd.xlane.f32.xlu0 %v526_v14  ;;  %530 = vadd.xlane.f32.xlu1 %v529_v15 }
  0x9f   : > { %v510_v16 = vpop.xlane.xlu0 %509  ;;  %v516_v17 = vpop.xlane.xlu1 %515 }
  0xa0   : > { %v533_v18 = vmul.f32 0.03125, %v510_v16  ;;  %v535_v19 = vmul.f32 0.03125, %v516_v17 }
  0xa2   : > { %v3479_v20 = vsub.f32 %v499_v0, %v533_v18  ;;  %v3481_v21 = vsub.f32 %v501_v1, %v535_v19  ;;  %v2695_v19 = vld [vmem:[%s4229_s2] ss:$0 sm:$0xff] }
  0xa3   : > { %v513_v22 = vpop.xlane.xlu0 %512  ;;  %v519_v23 = vpop.xlane.xlu1 %518 }
  0xa4   : > { %v534_v24 = vmul.f32 0.03125, %v513_v22  ;;  %v536_v25 = vmul.f32 0.03125, %v519_v23  ;;  %v549_v26 = vmul.f32 %v3479_v20, %v3479_v20  ;;  %v551_v27 = vmul.f32 %v3481_v21, %v3481_v21 }
  0xa6   : > { %v3487_v28 = vsub.f32 %v500_v2, %v534_v24  ;;  %v3489_v29 = vsub.f32 %v502_v5, %v536_v25  ;;  %v557_v30 = vsel %vm507_vm0, %v549_v26, 0.0  ;;  %v563_v33 = vsel %vm507_vm0, %v551_v27, 0.0  ;;  %v2696_v27 = vld [vmem:[%s4230_s3] ss:$0 sm:$0xff] }
  0xa7   : > { %558 = vadd.xlane.f32.xlu0 %v557_v30  ;;  %v522_v31 = vpop.xlane.xlu0 %521  ;;  %v525_v32 = vpop.xlane.xlu1 %524 }
  0xa8   : > { %v537_v34 = vmul.f32 0.03125, %v522_v31  ;;  %v538_v35 = vmul.f32 0.03125, %v525_v32  ;;  %v550_v36 = vmul.f32 %v3487_v28, %v3487_v28  ;;  %v552_v37 = vmul.f32 %v3489_v29, %v3489_v29 }
  0xaa   : > { %v3497_v38 = vsub.f32 %v503_v7, %v537_v34  ;;  %v3499_v39 = vsub.f32 %v504_v9, %v538_v35  ;;  %v560_v40 = vsel %vm507_vm0, %v550_v36, 0.0  ;;  %v566_v43 = vsel %vm507_vm0, %v552_v37, 0.0 }
  0xab   : > { %564 = vadd.xlane.f32.xlu0 %v563_v33  ;;  %561 = vadd.xlane.f32.xlu1 %v560_v40  ;;  %v528_v41 = vpop.xlane.xlu0 %527  ;;  %v531_v42 = vpop.xlane.xlu1 %530 }
  0xac   : > { %v539_v44 = vmul.f32 0.03125, %v528_v41  ;;  %v540_v45 = vmul.f32 0.03125, %v531_v42  ;;  %v553_v46 = vmul.f32 %v3497_v38, %v3497_v38  ;;  %v554_v47 = vmul.f32 %v3499_v39, %v3499_v39 }
  0xae   : > { %v3507_v48 = vsub.f32 %v505_v12, %v539_v44  ;;  %v3509_v49 = vsub.f32 %v506_v13, %v540_v45  ;;  %v569_v50 = vsel %vm507_vm0, %v553_v46, 0.0  ;;  %v572_v51 = vsel %vm507_vm0, %v554_v47, 0.0 }
  0xaf   : > { %567 = vadd.xlane.f32.xlu1 %v566_v43  ;;  %570 = vadd.xlane.f32.xlu0 %v569_v50 }
  0xb0   : > { %v555_v52 = vmul.f32 %v3507_v48, %v3507_v48  ;;  %v556_v53 = vmul.f32 %v3509_v49, %v3509_v49 }
  0xb2   : > { %v575_v54 = vsel %vm507_vm0, %v555_v52, 0.0  ;;  %v578_v55 = vsel %vm507_vm0, %v556_v53, 0.0 }
  0xb3   : > { %573 = vadd.xlane.f32.xlu1 %v572_v51  ;;  %576 = vadd.xlane.f32.xlu0 %v575_v54 }
  0xb7   : > { %579 = vadd.xlane.f32.xlu1 %v578_v55 }
 0x134   : > { %v559_v58 = vpop.xlane.xlu0 %558 }
 0x135   : > { %v581_v59 = vmul.f32 0.03125, %v559_v58 }
 0x137   : > { %v589_v60 = vadd.f32 1e-05, %v581_v59 }
 0x138   : > { %v562_v61 = vpop.xlane.xlu1 %561  ;;  %v565_v62 = vpop.xlane.xlu0 %564 }
 0x139   : > { %3167 = vrsqrt.f32 %v589_v60  ;;  %v582_v63 = vmul.f32 0.03125, %v562_v61  ;;  %v583_v0 = vmul.f32 0.03125, %v565_v62 }
 0x13b   : > { %v590_v1 = vadd.f32 1e-05, %v582_v63  ;;  %v591_v2 = vadd.f32 1e-05, %v583_v0 }
 0x13c   : > { %v568_v3 = vpop.xlane.xlu1 %567  ;;  %v571_v4 = vpop.xlane.xlu0 %570 }
 0x13d   : > { %3169 = vrsqrt.f32 %v590_v1  ;;  %v584_v5 = vmul.f32 0.03125, %v568_v3  ;;  %v585_v6 = vmul.f32 0.03125, %v571_v4 }
 0x13e   : > { %3171 = vrsqrt.f32 %v591_v2 }
 0x13f   : > { %v592_v7 = vadd.f32 1e-05, %v584_v5  ;;  %v593_v8 = vadd.f32 1e-05, %v585_v6 }
 0x140   : > { %v574_v9 = vpop.xlane.xlu1 %573  ;;  %v577_v10 = vpop.xlane.xlu0 %576 }
 0x141   : > { %3173 = vrsqrt.f32 %v592_v7  ;;  %v586_v11 = vmul.f32 0.03125, %v574_v9  ;;  %v587_v12 = vmul.f32 0.03125, %v577_v10 }
 0x142   : > { %3175 = vrsqrt.f32 %v593_v8 }
 0x143   : > { %v3168_v13 = vpop.eup %3167  ;;  %v594_v14 = vadd.f32 1e-05, %v586_v11  ;;  %v595_v15 = vadd.f32 1e-05, %v587_v12 }
 0x144   : > { %v580_v16 = vpop.xlane.xlu1 %579  ;;  %v605_v17 = vmul.f32 %v3168_v13, %v3479_v20 }
 0x145   : > { %3177 = vrsqrt.f32 %v594_v14  ;;  %v588_v18 = vmul.f32 0.03125, %v580_v16 }
 0x146   : > { %3179 = vrsqrt.f32 %v595_v15  ;;  %v620_v26 = vmul.f32 %v2695_v19, %v605_v17 }
 0x147   : > { %v3170_v22 = vpop.eup %3169  ;;  %v596_v23 = vadd.f32 1e-05, %v588_v18 }
 0x148   : > { %v3172_v24 = vpop.eup %3171  ;;  %v606_v25 = vmul.f32 %v3170_v22, %v3487_v28  ;;  %v635_v33 = vadd.f32 %v2696_v27, %v620_v26 }
 0x149   : > { %3181 = vrsqrt.f32 %v596_v23  ;;  %v607_v20 = vmul.f32 %v3172_v24, %v3481_v21 }
 0x14a   : > { %v621_v30 = vmul.f32 %v2695_v19, %v606_v25 }
 0x14b   : > { %v3174_v31 = vpop.eup %3173  ;;  %v622_v36 = vmul.f32 %v2695_v19, %v607_v20 }
 0x14c   : > { %v3176_v32 = vpop.eup %3175  ;;  %v636_v34 = vadd.f32 %v2696_v27, %v621_v30  ;;  %v608_v35 = vmul.f32 %v3174_v31, %v3489_v29 }
 0x14d   : > { %v609_v37 = vmul.f32 %v3176_v32, %v3497_v38  ;;  %v637_v43 = vadd.f32 %v2696_v27, %v622_v36  ;;  %v3585_v36 = vld [vmem:[%s4228_s1 + $0x10] sm:$0xff] }
 0x14e   : > { %v643_v40 = vpack.c.bf16 %v636_v34, %v635_v33  ;;  %v623_v28 = vmul.f32 %v2695_v19, %v608_v35 }
 0x14f   : > { %v3178_v41 = vpop.eup %3177  ;;  %v624_v45 = vmul.f32 %v2695_v19, %v609_v37 }
 0x150   : > { %v3180_v42 = vpop.eup %3179  ;;  %2869 = vmatprep.mubr.msk.bf16.mxu0 %vm507_vm0, %v643_v40  ;;  %v638_v44 = vadd.f32 %v2696_v27, %v623_v28  ;;  %v610_v21 = vmul.f32 %v3178_v41, %v3499_v39  ;;  %v3590_v40 = vld [vmem:[%s4228_s1] sm:$0xff] }
 0x151   : > { %v611_v46 = vmul.f32 %v3180_v42, %v3507_v48  ;;  %v639_v29 = vadd.f32 %v2696_v27, %v624_v45  ;;  %v2697_v48 = vld [vmem:[%s4232_s5] ss:$0 sm:$0xff]  ;;  %v3596_v42 = vld [vmem:[%s4228_s1 + $0x8] sm:$0xff] }
 0x152   : > { %v644_v47 = vpack.c.bf16 %v638_v44, %v637_v43  ;;  %v625_v50 = vmul.f32 %v2695_v19, %v610_v21 }
 0x153   : > { %v3182_v51 = vpop.eup %3181  ;;  %v626_v53 = vmul.f32 %v2695_v19, %v611_v46  ;;  %v3603_v46 = vld [vmem:[%s4228_s1 + $0x18] sm:$0xff] }
 0x154   : > { %2870 = vmatmul.mubr.msk.bf16.vlgmr.msra.gmra.mrb[0].mxu0 %vm507_vm0, %v644_v47  ;;  %v640_v38 = vadd.f32 %v2696_v27, %v625_v50  ;;  %v612_v52 = vmul.f32 %v3182_v51, %v3509_v49 }
 0x155   : > { %v641_v56 = vadd.f32 %v2696_v27, %v626_v53 }
 0x156   : > { %v645_v54 = vpack.c.bf16 %v640_v38, %v639_v29  ;;  %v627_v55 = vmul.f32 %v2695_v19, %v612_v52  ;;  %v3612_v38 = vld [vmem:[%s4228_s1 + $0x30] sm:$0xff] }
 0x158   : > { %2873 = vmatprep.mubr.msk.bf16.mxu0 %vm507_vm0, %v645_v54  ;;  %v642_v57 = vadd.f32 %v2696_v27, %v627_v55 }
 0x15a   : > { %v646_v39 = vpack.c.bf16 %v642_v57, %v641_v56 }
 0x15c   : > { %2874 = vmatmul.mubr.msk.bf16.gmra.mrb[4].mxu0 %vm507_vm0, %v646_v39  ;;  %v3619_v39 = vld [vmem:[%s4228_s1 + $0x20] sm:$0xff] }
 0x227   : > { %v2871_v58 = vpop.f32.mrb[0].mxu0 }
 0x228   : > { %v725_v59 = vadd.f32 %v2871_v58, %v2697_v48  ;;  %v716_v60 = vpop.f32.mrb[1].mxu0 }
 0x229   : > { %v717_v61 = vadd.f32 %v2697_v48, %v716_v60  ;;  %v2872_v62 = vpop.f32.mrb[2].mxu0  ;;  %v3630_v60 = vld [vmem:[%s4228_s1 + $0x38] sm:$0xff] }
 0x22a   : > { %v728_v49 = vadd.f32 %v2872_v62, %v2697_v48  ;;  %v719_v63 = vpop.f32.mrb[3].mxu0  ;;  %v757_v1 = vmul.f32 0.35355338, %v725_v59  ;;  %v3638_v62 = vld [vmem:[%s4228_s1 + $0x28] sm:$0xff] }
 0x22b   : > { %v720_v0 = vadd.f32 %v2697_v48, %v719_v63  ;;  %v755_v4 = vmul.f32 0.35355338, %v717_v61 }
 0x22c   : > { %v758_v2 = vmul.f32 0.35355338, %v728_v49  ;;  %v3546_v3 = vpack.c.bf16 %v728_v49, %v725_v59 }
 0x22d   : > { %v756_v5 = vmul.f32 0.35355338, %v720_v0  ;;  %v3548_v6 = vpack.c.bf16 %v720_v0, %v717_v61 }
 0x22e   : > { %v3550_v7 = vpack.c.bf16 %v758_v2, %v757_v1  ;;  %777 = vrot.lane.b32.xlu1 %v3546_v3, %s3351_s23 }
 0x22f   : > { %v3553_v8 = vpack.c.bf16 %v756_v5, %v755_v4  ;;  %775 = vrot.lane.b32.xlu0 %v3548_v6, %s3351_s23  ;;  %v2875_v9 = vpop.f32.mrb[4].mxu0 }
 0x230   : > { %v741_v10 = vadd.f32 %v2875_v9, %v2697_v48  ;;  %v732_v11 = vpop.f32.mrb[5].mxu0 }
 0x231   : > { %v733_v12 = vadd.f32 %v2697_v48, %v732_v11  ;;  %v2876_v13 = vpop.f32.mrb[6].mxu0  ;;  %2885 = vmatprep.mubr.msk.bf16.mxu1 %vm783_vm1, %v3553_v8 }
 0x232   : > { %v744_v14 = vadd.f32 %v2876_v13, %v2697_v48  ;;  %v735_v15 = vpop.f32.mrb[7].mxu0  ;;  %v761_v17 = vmul.f32 0.35355338, %v741_v10 }
 0x233   : > { %v736_v16 = vadd.f32 %v2697_v48, %v735_v15  ;;  %v759_v22 = vmul.f32 0.35355338, %v733_v12 }
 0x234   : > { %v762_v18 = vmul.f32 0.35355338, %v744_v14  ;;  %v3558_v19 = vpack.c.bf16 %v744_v14, %v741_v10 }
 0x235   : > { %v760_v23 = vmul.f32 0.35355338, %v736_v16  ;;  %v3560_v24 = vpack.c.bf16 %v736_v16, %v733_v12 }
 0x236   : > { %v3562_v25 = vpack.c.bf16 %v762_v18, %v761_v17 }
 0x237   : > { %v3564_v26 = vpack.c.bf16 %v760_v23, %v759_v22  ;;  %779 = vrot.lane.b32.xlu1 %v3560_v24, %s3351_s23 }
 0x23b   : > { %781 = vrot.lane.b32.xlu1 %v3558_v19, %s3351_s23  ;;  %s3357_s23 = smov 112  }
 0x2a0   : > { %v778_v30 = vpop.permute.xlu1 %777 }
 0x2a1   : > { %v776_v27 = vpop.permute.xlu0 %775  ;;  %v800_v31 = vsel %vm783_vm1, %v778_v30, 0 }
 0x2a2   : > { %3057 = vmatprep.subr.msk.bf16.mxu1 %vm783_vm1, %v776_v27  ;;  %v797_v20 = vsel %vm783_vm1, %v776_v27, 0 }
 0x2a3   : > { %2878 = vmatpush3.bf16.xpose.msra.mxu1 %v797_v20 }
 0x2a4   : > { %3058 = vmatprep.subr.msk.bf16.mxu1 %vm783_vm1, %v778_v30 }
 0x2a9   : > { %v780_v32 = vpop.permute.xlu1 %779 }
 0x2aa   : > { %v803_v33 = vsel %vm783_vm1, %v780_v32, 0 }
 0x2ab   : > { %2880 = vmatpush3.bf16.xpose.msra.mxu1 %v800_v31 }
 0x2ac   : > { %3059 = vmatprep.subr.msk.bf16.mxu1 %vm783_vm1, %v780_v32 }
 0x2ad   : > { %v782_v34 = vpop.permute.xlu1 %781 }
 0x2ae   : > { %v806_v35 = vsel %vm783_vm1, %v782_v34, 0 }
 0x2b3   : > { %2882 = vmatpush3.bf16.xpose.msra.mxu1 %v803_v33 }
 0x2b4   : > { %3060 = vmatprep.subr.msk.bf16.mxu1 %vm783_vm1, %v782_v34 }
 0x2bb   : > { %2884 = vmatpush3.bf16.xpose.msra.mxu1 %v806_v35 }
 0x2c2   : > { %2886 = vmatmul.mubr.msk.bf16.vlgmr.msra.gmra.mrb[0].mxu1 %vm783_vm1, %v3550_v7 }
 0x2c3   : > { %2889 = vmatprep.mubr.msk.bf16.mxu1 %vm783_vm1, %v3564_v26 }
 0x2ca   : > { %2890 = vmatmul.mubr.msk.bf16.gmra.mrb[4].mxu1 %vm783_vm1, %v3562_v25 }
 0x395   : > { %v2887_v37 = vpop.f32.mrb[0].mxu1 }
 0x396   : > { %v851_v28 = vadd.f32 %v2887_v37, %v3585_v36  ;;  %v842_v41 = vpop.f32.mrb[1].mxu1 }
 0x397   : > { %v2888_v43 = vpop.f32.mrb[2].mxu1  ;;  %v843_v44 = vadd.f32 %v842_v41, %v3590_v40 }
 0x398   : > { %v845_v21 = vpop.f32.mrb[3].mxu1  ;;  %v880_v45 = vsel %vm873_vm2, %v851_v28, -inf  ;;  %v854_v51 = vadd.f32 %v2888_v43, %v3603_v46 }
 0x399   : > { %v846_v47 = vadd.f32 %v845_v21, %v3596_v42  ;;  %881 = vmax.xlane.f32.xlu0 %v880_v45  ;;  %v874_v29 = vsel %vm873_vm2, %v843_v44, -inf }
 0x39a   : > { %v883_v57 = vsel %vm873_vm2, %v854_v51, -inf }
 0x39b   : > { %v877_v50 = vsel %vm873_vm2, %v846_v47, -inf }
 0x39c   : > { %878 = vmax.xlane.f32.xlu1 %v877_v50 }
 0x39d   : > { %v2891_v52 = vpop.f32.mrb[4].mxu1  ;;  %875 = vmax.xlane.f32.xlu0 %v874_v29 }
 0x39e   : > { %v858_v53 = vpop.f32.mrb[5].mxu1  ;;  %v867_v55 = vadd.f32 %v2891_v52, %v3612_v38 }
 0x39f   : > { %v2892_v54 = vpop.f32.mrb[6].mxu1  ;;  %v859_v48 = vadd.f32 %v858_v53, %v3619_v39 }
 0x3a0   : > { %v861_v56 = vpop.f32.mrb[7].mxu1  ;;  %v892_v58 = vsel %vm873_vm2, %v867_v55, -inf  ;;  %v3633_v61 = vadd.f32 %v2892_v54, %v3630_v60 }
 0x3a1   : > { %884 = vmax.xlane.f32.xlu0 %v883_v57  ;;  %v886_v59 = vsel %vm873_vm2, %v859_v48, -inf  ;;  %v3641_v49 = vadd.f32 %v861_v56, %v3638_v62 }
 0x3a2   : > { %v895_v63 = vsel %vm873_vm2, %v3633_v61, -inf }
 0x3a3   : > { %v889_v0 = vsel %vm873_vm2, %v3641_v49, -inf }
 0x3a5   : > { %893 = vmax.xlane.f32.xlu0 %v892_v58 }
 0x3a9   : > { %887 = vmax.xlane.f32.xlu0 %v886_v59 }
 0x3ad   : > { %968 = vrot.lane.b32.xlu1 %v3546_v3, %s3352_s26 }
 0x3b1   : > { %970 = vrot.lane.b32.xlu1 %v3560_v24, %s3352_s26 }
 0x3bf   : > { %966 = vrot.lane.b32.xlu0 %v3548_v6, %s3352_s26 }
 0x3d5   : > { %896 = vmax.xlane.f32.xlu1 %v895_v63 }
 0x3d9   : > { %890 = vmax.xlane.f32.xlu1 %v889_v0 }
 0x3ea   : > { %972 = vrot.lane.b32.xlu1 %v3558_v19, %s3352_s26  ;;  %s3359_s26 = smov 72  }
 0x426   : > { %v882_v1 = vpop.xlane.xlu0 %881 }
 0x427   : > { %v900_v2 = vsub.f32 %v851_v28, %v882_v1 }
 0x429   : > { %v910_v4 = vmul.f32 1.442695, %v900_v2  ;;  %v879_v5 = vpop.xlane.xlu1 %878 }
 0x42a   : > { %v876_v9 = vpop.xlane.xlu0 %875  ;;  %v899_v11 = vsub.f32 %v846_v47, %v879_v5 }
 0x42b   : > { %3183 = vpow2.f32 %v910_v4  ;;  %v898_v10 = vsub.f32 %v843_v44, %v876_v9 }
 0x42c   : > { %v908_v15 = vmul.f32 1.442695, %v899_v11 }
 0x42d   : > { %v906_v12 = vmul.f32 1.442695, %v898_v10  ;;  %v969_v33 = vpop.permute.xlu1 %968 }
 0x42e   : > { %v885_v13 = vpop.xlane.xlu0 %884 }
 0x42f   : > { %3185 = vpow2.f32 %v906_v12  ;;  %v901_v14 = vsub.f32 %v854_v51, %v885_v13 }
 0x431   : > { %v912_v16 = vmul.f32 1.442695, %v901_v14  ;;  %v971_v43 = vpop.permute.xlu1 %970 }
 0x432   : > { %v894_v17 = vpop.xlane.xlu0 %893 }
 0x433   : > { %3187 = vpow2.f32 %v912_v16  ;;  %v904_v18 = vsub.f32 %v867_v55, %v894_v17 }
 0x434   : > { %3189 = vpow2.f32 %v908_v15 }
 0x435   : > { %v3648_v22 = vpop.eup %3183  ;;  %v918_v23 = vmul.f32 1.442695, %v904_v18 }
 0x436   : > { %v888_v27 = vpop.xlane.xlu0 %887  ;;  %v928_v20 = vsel %vm873_vm2, %v3648_v22, 0.0 }
 0x437   : > { %3191 = vpow2.f32 %v918_v23  ;;  %v902_v30 = vsub.f32 %v859_v48, %v888_v27  ;;  %929 = vadd.xlane.f32.xlu0 %v928_v20 }
 0x439   : > { %v3652_v31 = vpop.eup %3185  ;;  %v914_v32 = vmul.f32 1.442695, %v902_v30 }
 0x43a   : > { %v967_v34 = vpop.permute.xlu0 %966  ;;  %v922_v35 = vsel %vm873_vm2, %v3652_v31, 0.0 }
 0x43b   : > { %3193 = vpow2.f32 %v914_v32  ;;  %923 = vadd.xlane.f32.xlu0 %v922_v35  ;;  %2893 = vmatprep.subr.bf16.mxu0 %v967_v34 }
 0x43c   : > { %2894 = vmatpush3.bf16.msra.mxu0 %v967_v34 }
 0x43d   : > { %v3188_v37 = vpop.eup %3187  ;;  %2895 = vmatprep.subr.bf16.mxu0 %v969_v33 }
 0x43e   : > { %v931_v28 = vsel %vm873_vm2, %v3188_v37, 0.0  ;;  %v3190_v41 = vpop.eup %3189 }
 0x43f   : > { %932 = vadd.xlane.f32.xlu1 %v931_v28  ;;  %v925_v21 = vsel %vm873_vm2, %v3190_v41, 0.0 }
 0x440   : > { %2896 = vmatpush3.bf16.msra.mxu0 %v969_v33 }
 0x441   : > { %v3657_v44 = vpop.eup %3191  ;;  %2897 = vmatprep.subr.bf16.mxu0 %v971_v43 }
 0x442   : > { %v940_v45 = vsel %vm873_vm2, %v3657_v44, 0.0 }
 0x443   : > { %926 = vadd.xlane.f32.xlu1 %v925_v21  ;;  %941 = vadd.xlane.f32.xlu0 %v940_v45 }
 0x444   : > { %2898 = vmatpush3.bf16.msra.mxu0 %v971_v43 }
 0x445   : > { %v3662_v47 = vpop.eup %3193 }
 0x446   : > { %v934_v50 = vsel %vm873_vm2, %v3662_v47, 0.0 }
 0x447   : > { %935 = vadd.xlane.f32.xlu0 %v934_v50 }
 0x454   : > { %1069 = vrot.lane.b32.xlu1 %v3546_v3, %s3353_s16 }
 0x458   : > { %1071 = vrot.lane.b32.xlu1 %v3560_v24, %s3353_s16 }
 0x462   : > { %v897_v51 = vpop.xlane.xlu1 %896 }
 0x463   : > { %v905_v29 = vsub.f32 %v3633_v61, %v897_v51 }
 0x465   : > { %v920_v52 = vmul.f32 1.442695, %v905_v29 }
 0x466   : > { %v891_v53 = vpop.xlane.xlu1 %890 }
 0x467   : > { %3195 = vpow2.f32 %v920_v52  ;;  %v903_v54 = vsub.f32 %v3641_v49, %v891_v53 }
 0x469   : > { %v916_v55 = vmul.f32 1.442695, %v903_v54 }
 0x46a   : > { %v973_v56 = vpop.permute.xlu1 %972 }
 0x46b   : > { %2899 = vmatprep.subr.bf16.mxu0 %v973_v56  ;;  %3197 = vpow2.f32 %v916_v55 }
 0x46c   : > { %2900 = vmatpush3.bf16.msra.mxu0 %v973_v56 }
 0x471   : > { %v3196_v57 = vpop.eup %3195 }
 0x472   : > { %v943_v48 = vsel %vm873_vm2, %v3196_v57, 0.0 }
 0x473   : > { %944 = vadd.xlane.f32.xlu0 %v943_v48 }
 0x475   : > { %v3198_v58 = vpop.eup %3197 }
 0x476   : > { %v937_v59 = vsel %vm873_vm2, %v3198_v58, 0.0 }
 0x47c   : > { %938 = vadd.xlane.f32.xlu1 %v937_v59 }
 0x489   : > { %1067 = vrot.lane.b32.xlu0 %v3548_v6, %s3353_s16 }
 0x48d   : > { %1073 = vrot.lane.b32.xlu1 %v3558_v19, %s3353_s16  ;;  %1059 = vrot.lane.b32.xlu0 %v3553_v8, %s3354_s17 }
 0x491   : > { %1061 = vrot.lane.b32.xlu1 %v3550_v7, %s3354_s17  ;;  %1063 = vrot.lane.b32.xlu0 %v3564_v26, %s3354_s17 }
 0x495   : > { %1065 = vrot.lane.b32.xlu1 %v3562_v25, %s3354_s17 }
 0x4c4   : > { %v930_v61 = vpop.xlane.xlu0 %929 }
 0x4c8   : > { %v924_v49 = vpop.xlane.xlu0 %923 }
 0x4cc   : > { %v933_v63 = vpop.xlane.xlu1 %932 }
 0x4cd   : > { %3199 = vrcp.f32 %v933_v63 }
 0x4ce   : > { %3201 = vrcp.f32 %v924_v49 }
 0x4cf   : > { %3203 = vrcp.f32 %v930_v61 }
 0x4d0   : > { %v927_v0 = vpop.xlane.xlu1 %926  ;;  %v942_v15 = vpop.xlane.xlu0 %941 }
 0x4d1   : > { %3205 = vrcp.f32 %v927_v0 }
 0x4d4   : > { %v936_v16 = vpop.xlane.xlu0 %935  ;;  %v1070_v17 = vpop.permute.xlu1 %1069 }
 0x4d5   : > { %v1091_v30 = vsel %vm783_vm1, %v1070_v17, 0 }
 0x4d7   : > { %v3200_v1 = vpop.eup %3199 }
 0x4d8   : > { %v3202_v2 = vpop.eup %3201  ;;  %v957_v9 = vmul.f32 %v3200_v1, %v3188_v37  ;;  %v1072_v27 = vpop.permute.xlu1 %1071 }
 0x4d9   : > { %v3204_v4 = vpop.eup %3203  ;;  %v954_v10 = vmul.f32 %v3202_v2, %v3652_v31  ;;  %v1094_v37 = vsel %vm783_vm1, %v1072_v27, 0 }
 0x4da   : > { %v956_v12 = vmul.f32 %v3204_v4, %v3648_v22 }
 0x4db   : > { %v3206_v5 = vpop.eup %3205 }
 0x4dc   : > { %v955_v11 = vmul.f32 %v3206_v5, %v3190_v41  ;;  %v963_v14 = vpack.c.bf16 %v957_v9, %v956_v12 }
 0x4de   : > { %v962_v13 = vpack.c.bf16 %v955_v11, %v954_v10 }
 0x4e0   : > { %2901 = vmatprep.mubr.msk.bf16.mxu0 %vm873_vm2, %v962_v13 }
 0x4e1   : > { %2902 = vmatmul.mubr.msk.bf16.vlgmr.msra.gmra.mrb[8].mxu0 %vm873_vm2, %v963_v14 }
 0x500   : > { %v945_v18 = vpop.xlane.xlu0 %944 }
 0x501   : > { %3207 = vrcp.f32 %v945_v18 }
 0x502   : > { %3209 = vrcp.f32 %v936_v16 }
 0x503   : > { %3211 = vrcp.f32 %v942_v15 }
 0x504   : > { %v1068_v23 = vpop.permute.xlu0 %1067 }
 0x505   : > { %3061 = vmatprep.subr.msk.bf16.mxu0 %vm783_vm1, %v1068_v23  ;;  %v1088_v20 = vsel %vm783_vm1, %v1068_v23, 0 }
 0x506   : > { %2910 = vmatpush3.bf16.xpose.msra.mxu0 %v1088_v20 }
 0x507   : > { %3062 = vmatprep.subr.msk.bf16.mxu0 %vm783_vm1, %v1070_v17 }
 0x508   : > { %v1060_v51 = vpop.permute.xlu0 %1059 }
 0x509   : > { %v939_v22 = vpop.xlane.xlu1 %938 }
 0x50a   : > { %3213 = vrcp.f32 %v939_v22 }
 0x50b   : > { %v3208_v31 = vpop.eup %3207 }
 0x50c   : > { %v3210_v32 = vpop.eup %3209  ;;  %v961_v35 = vmul.f32 %v3208_v31, %v3196_v57  ;;  %v1064_v52 = vpop.permute.xlu0 %1063 }
 0x50d   : > { %v3212_v33 = vpop.eup %3211  ;;  %v958_v28 = vmul.f32 %v3210_v32, %v3662_v47  ;;  %v1074_v43 = vpop.permute.xlu1 %1073 }
 0x50e   : > { %2912 = vmatpush3.bf16.xpose.msra.mxu0 %v1091_v30  ;;  %v960_v21 = vmul.f32 %v3212_v33, %v3657_v44  ;;  %v1097_v29 = vsel %vm783_vm1, %v1074_v43, 0 }
 0x50f   : > { %3063 = vmatprep.subr.msk.bf16.mxu0 %vm783_vm1, %v1072_v27 }
 0x510   : > { %v965_v50 = vpack.c.bf16 %v961_v35, %v960_v21 }
 0x511   : > { %v1062_v47 = vpop.permute.xlu1 %1061 }
 0x514   : > { %v3214_v34 = vpop.eup %3213 }
 0x515   : > { %v959_v41 = vmul.f32 %v3214_v34, %v3198_v58  ;;  %v1066_v44 = vpop.permute.xlu1 %1065 }
 0x516   : > { %2914 = vmatpush3.bf16.xpose.msra.mxu0 %v1094_v37 }
 0x517   : > { %3064 = vmatprep.subr.msk.bf16.mxu0 %vm783_vm1, %v1074_v43  ;;  %v964_v45 = vpack.c.bf16 %v959_v41, %v958_v28 }
 0x519   : > { %2905 = vmatprep.mubr.msk.bf16.mxu0 %vm873_vm2, %v964_v45 }
 0x51a   : > { %2906 = vmatmul.mubr.msk.bf16.gmra.mrb[12].mxu0 %vm873_vm2, %v965_v50 }
 0x51b   : > { %2917 = vmatprep.mubr.msk.bf16.mxu0 %vm783_vm1, %v1060_v51 }
 0x51e   : > { %2916 = vmatpush3.bf16.xpose.msra.mxu0 %v1097_v29 }
 0x525   : > { %2918 = vmatmul.mubr.msk.bf16.vlgmr.msra.gmra.mrb[16].mxu0 %vm783_vm1, %v1062_v47 }
 0x526   : > { %2921 = vmatprep.mubr.msk.bf16.mxu0 %vm783_vm1, %v1064_v52 }
 0x52d   : > { %2922 = vmatmul.mubr.msk.bf16.gmra.mrb[20].mxu0 %vm783_vm1, %v1066_v44 }
 0x5b4   : > { %v3698_v53 = vpop.f32.mrb[8].mxu0 }
 0x5b5   : > { %v3700_v54 = vpop.f32.mrb[9].mxu0 }
 0x5b6   : > { %v3702_v55 = vpop.f32.mrb[10].mxu0 }
 0x5b7   : > { %v3704_v56 = vpop.f32.mrb[11].mxu0 }
 0x5ed   : > { %v3706_v57 = vpop.f32.mrb[12].mxu0 }
 0x5ee   : > { %v3708_v48 = vpop.f32.mrb[13].mxu0 }
 0x5ef   : > { %v3710_v58 = vpop.f32.mrb[14].mxu0 }
 0x5f0   : > { %v3712_v59 = vpop.f32.mrb[15].mxu0 }
 0x5f8   : > { %v2919_v61 = vpop.f32.mrb[16].mxu0 }
 0x5f9   : > { %v1142_v49 = vadd.f32 %v2919_v61, %v3585_v36  ;;  %v1133_v63 = vpop.f32.mrb[17].mxu0 }
 0x5fa   : > { %v2920_v0 = vpop.f32.mrb[18].mxu0  ;;  %v1134_v1 = vadd.f32 %v1133_v63, %v3590_v40 }
 0x5fb   : > { %v1136_v2 = vpop.f32.mrb[19].mxu0  ;;  %v1170_v4 = vsel %vm873_vm2, %v1142_v49, -inf  ;;  %v1145_v10 = vadd.f32 %v2920_v0, %v3603_v46 }
 0x5fc   : > { %v1137_v5 = vadd.f32 %v1136_v2, %v3596_v42  ;;  %1171 = vmax.xlane.f32.xlu0 %v1170_v4  ;;  %v1164_v11 = vsel %vm873_vm2, %v1134_v1, -inf }
 0x5fd   : > { %v1173_v17 = vsel %vm873_vm2, %v1145_v10, -inf }
 0x5fe   : > { %v1167_v9 = vsel %vm873_vm2, %v1137_v5, -inf }
 0x5ff   : > { %1168 = vmax.xlane.f32.xlu1 %v1167_v9 }
 0x600   : > { %1165 = vmax.xlane.f32.xlu0 %v1164_v11  ;;  %v2923_v12 = vpop.f32.mrb[20].mxu0 }
 0x601   : > { %v1149_v13 = vpop.f32.mrb[21].mxu0  ;;  %v1158_v15 = vadd.f32 %v2923_v12, %v3612_v38 }
 0x602   : > { %v2924_v14 = vpop.f32.mrb[22].mxu0  ;;  %v1150_v18 = vadd.f32 %v1149_v13, %v3619_v39 }
 0x603   : > { %v1152_v16 = vpop.f32.mrb[23].mxu0  ;;  %v1182_v23 = vsel %vm873_vm2, %v1158_v15, -inf  ;;  %v3730_v20 = vadd.f32 %v2924_v14, %v3630_v60 }
 0x604   : > { %1174 = vmax.xlane.f32.xlu0 %v1173_v17  ;;  %v1176_v27 = vsel %vm873_vm2, %v1150_v18, -inf  ;;  %v3733_v22 = vadd.f32 %v1152_v16, %v3638_v62 }
 0x605   : > { %v1185_v30 = vsel %vm873_vm2, %v3730_v20, -inf }
 0x606   : > { %v1179_v31 = vsel %vm873_vm2, %v3733_v22, -inf }
 0x608   : > { %1183 = vmax.xlane.f32.xlu0 %v1182_v23 }
 0x60c   : > { %1177 = vmax.xlane.f32.xlu0 %v1176_v27 }
 0x610   : > { %1258 = vrot.lane.b32.xlu1 %v3546_v3, %s3355_s19 }
 0x614   : > { %1260 = vrot.lane.b32.xlu1 %v3560_v24, %s3355_s19 }
 0x622   : > { %1256 = vrot.lane.b32.xlu0 %v3548_v6, %s3355_s19 }
 0x638   : > { %1186 = vmax.xlane.f32.xlu1 %v1185_v30 }
 0x63c   : > { %1180 = vmax.xlane.f32.xlu1 %v1179_v31 }
 0x64d   : > { %1262 = vrot.lane.b32.xlu1 %v3558_v19, %s3355_s19  ;;  %s3361_s19 = smov 40  }
 0x689   : > { %v1172_v32 = vpop.xlane.xlu0 %1171 }
 0x68a   : > { %v1190_v33 = vsub.f32 %v1142_v49, %v1172_v32 }
 0x68c   : > { %v1200_v34 = vmul.f32 1.442695, %v1190_v33  ;;  %v1169_v35 = vpop.xlane.xlu1 %1168 }
 0x68d   : > { %v1166_v37 = vpop.xlane.xlu0 %1165  ;;  %v1189_v41 = vsub.f32 %v1137_v5, %v1169_v35 }
 0x68e   : > { %3215 = vpow2.f32 %v1200_v34  ;;  %v1188_v28 = vsub.f32 %v1134_v1, %v1166_v37 }
 0x68f   : > { %v1198_v50 = vmul.f32 1.442695, %v1189_v41 }
 0x690   : > { %v1196_v43 = vmul.f32 1.442695, %v1188_v28  ;;  %v1259_v2 = vpop.permute.xlu1 %1258 }
 0x691   : > { %v1175_v21 = vpop.xlane.xlu0 %1174 }
 0x692   : > { %3217 = vpow2.f32 %v1196_v43  ;;  %v1191_v45 = vsub.f32 %v1145_v10, %v1175_v21 }
 0x694   : > { %v1202_v51 = vmul.f32 1.442695, %v1191_v45  ;;  %v1261_v12 = vpop.permute.xlu1 %1260 }
 0x695   : > { %v1184_v29 = vpop.xlane.xlu0 %1183 }
 0x696   : > { %3219 = vpow2.f32 %v1202_v51  ;;  %v1194_v47 = vsub.f32 %v1158_v15, %v1184_v29 }
 0x697   : > { %3221 = vpow2.f32 %v1198_v50 }
 0x698   : > { %v3740_v52 = vpop.eup %3215  ;;  %v1208_v44 = vmul.f32 1.442695, %v1194_v47 }
 0x699   : > { %v1178_v61 = vpop.xlane.xlu0 %1177  ;;  %v1218_v49 = vsel %vm873_vm2, %v3740_v52, 0.0 }
 0x69a   : > { %3223 = vpow2.f32 %v1208_v44  ;;  %v1192_v63 = vsub.f32 %v1150_v18, %v1178_v61  ;;  %1219 = vadd.xlane.f32.xlu0 %v1218_v49 }
 0x69c   : > { %v3744_v0 = vpop.eup %3217  ;;  %v1204_v1 = vmul.f32 1.442695, %v1192_v63 }
 0x69d   : > { %v1257_v4 = vpop.permute.xlu0 %1256  ;;  %v1212_v5 = vsel %vm873_vm2, %v3744_v0, 0.0 }
 0x69e   : > { %3225 = vpow2.f32 %v1204_v1  ;;  %1213 = vadd.xlane.f32.xlu0 %v1212_v5  ;;  %2925 = vmatprep.subr.bf16.mxu1 %v1257_v4 }
 0x69f   : > { %2926 = vmatpush3.bf16.msra.mxu1 %v1257_v4 }
 0x6a0   : > { %v3220_v9 = vpop.eup %3219  ;;  %2927 = vmatprep.subr.bf16.mxu1 %v1259_v2 }
 0x6a1   : > { %v1221_v10 = vsel %vm873_vm2, %v3220_v9, 0.0  ;;  %v3222_v11 = vpop.eup %3221 }
 0x6a2   : > { %1222 = vadd.xlane.f32.xlu1 %v1221_v10  ;;  %v1215_v14 = vsel %vm873_vm2, %v3222_v11, 0.0 }
 0x6a3   : > { %2928 = vmatpush3.bf16.msra.mxu1 %v1259_v2 }
 0x6a4   : > { %v3749_v13 = vpop.eup %3223  ;;  %2929 = vmatprep.subr.bf16.mxu1 %v1261_v12 }
 0x6a5   : > { %v1230_v15 = vsel %vm873_vm2, %v3749_v13, 0.0 }
 0x6a6   : > { %1216 = vadd.xlane.f32.xlu1 %v1215_v14  ;;  %1231 = vadd.xlane.f32.xlu0 %v1230_v15 }
 0x6a7   : > { %2930 = vmatpush3.bf16.msra.mxu1 %v1261_v12 }
 0x6a8   : > { %v3754_v16 = vpop.eup %3225 }
 0x6a9   : > { %v1224_v17 = vsel %vm873_vm2, %v3754_v16, 0.0 }
 0x6aa   : > { %1225 = vadd.xlane.f32.xlu0 %v1224_v17 }
 0x6b7   : > { %1355 = vrot.lane.b32.xlu1 %v3546_v3, %s3356_s22 }
 0x6bb   : > { %1357 = vrot.lane.b32.xlu1 %v3560_v24, %s3356_s22 }
 0x6c5   : > { %v1187_v18 = vpop.xlane.xlu1 %1186 }
 0x6c6   : > { %v1195_v23 = vsub.f32 %v3730_v20, %v1187_v18 }
 0x6c8   : > { %v1210_v27 = vmul.f32 1.442695, %v1195_v23 }
 0x6c9   : > { %v1181_v30 = vpop.xlane.xlu1 %1180 }
 0x6ca   : > { %3227 = vpow2.f32 %v1210_v27  ;;  %v1193_v31 = vsub.f32 %v3733_v22, %v1181_v30 }
 0x6cc   : > { %v1206_v32 = vmul.f32 1.442695, %v1193_v31 }
 0x6cd   : > { %v1263_v33 = vpop.permute.xlu1 %1262 }
 0x6ce   : > { %2931 = vmatprep.subr.bf16.mxu1 %v1263_v33  ;;  %3229 = vpow2.f32 %v1206_v32 }
 0x6cf   : > { %2932 = vmatpush3.bf16.msra.mxu1 %v1263_v33 }
 0x6d4   : > { %v3228_v34 = vpop.eup %3227 }
 0x6d5   : > { %v1233_v35 = vsel %vm873_vm2, %v3228_v34, 0.0 }
 0x6d6   : > { %1234 = vadd.xlane.f32.xlu0 %v1233_v35 }
 0x6d8   : > { %v3230_v37 = vpop.eup %3229 }
 0x6d9   : > { %v1227_v28 = vsel %vm873_vm2, %v3230_v37, 0.0 }
 0x6df   : > { %1228 = vadd.xlane.f32.xlu1 %v1227_v28 }
 0x6ec   : > { %1353 = vrot.lane.b32.xlu0 %v3548_v6, %s3356_s22 }
 0x6f0   : > { %1359 = vrot.lane.b32.xlu1 %v3558_v19, %s3356_s22  ;;  %1345 = vrot.lane.b32.xlu0 %v3553_v8, %s3357_s23  ;;  %s3362_s22 = smov 8  }
 0x6f4   : > { %1347 = vrot.lane.b32.xlu1 %v3550_v7, %s3357_s23  ;;  %1349 = vrot.lane.b32.xlu0 %v3564_v26, %s3357_s23 }
 0x6f8   : > { %1351 = vrot.lane.b32.xlu1 %v3562_v25, %s3357_s23  ;;  %s3363_s23 = smov 16  }
 0x727   : > { %v1220_v20 = vpop.xlane.xlu0 %1219 }
 0x72b   : > { %v1214_v22 = vpop.xlane.xlu0 %1213 }
 0x72f   : > { %v1223_v41 = vpop.xlane.xlu1 %1222 }
 0x730   : > { %3231 = vrcp.f32 %v1223_v41 }
 0x731   : > { %3233 = vrcp.f32 %v1214_v22 }
 0x732   : > { %3235 = vrcp.f32 %v1220_v20 }
 0x733   : > { %v1217_v43 = vpop.xlane.xlu1 %1216  ;;  %v1232_v1 = vpop.xlane.xlu0 %1231 }
 0x734   : > { %3237 = vrcp.f32 %v1217_v43 }
 0x737   : > { %v1226_v2 = vpop.xlane.xlu0 %1225  ;;  %v1356_v4 = vpop.permute.xlu1 %1355 }
 0x73a   : > { %v3232_v21 = vpop.eup %3231 }
 0x73b   : > { %v3234_v45 = vpop.eup %3233  ;;  %v1247_v29 = vmul.f32 %v3232_v21, %v3220_v9  ;;  %v1358_v12 = vpop.permute.xlu1 %1357 }
 0x73c   : > { %v3236_v50 = vpop.eup %3235  ;;  %v1244_v47 = vmul.f32 %v3234_v45, %v3744_v0  ;;  %v1377_v0 = vsel %vm783_vm1, %v1356_v4, 0  ;;  %v1380_v23 = vsel %vm783_vm1, %v1358_v12, 0 }
 0x73d   : > { %v1246_v61 = vmul.f32 %v3236_v50, %v3740_v52 }
 0x73e   : > { %v3238_v51 = vpop.eup %3237 }
 0x73f   : > { %v1245_v44 = vmul.f32 %v3238_v51, %v3222_v11  ;;  %v1253_v63 = vpack.c.bf16 %v1247_v29, %v1246_v61 }
 0x741   : > { %v1252_v49 = vpack.c.bf16 %v1245_v44, %v1244_v47 }
 0x743   : > { %2933 = vmatprep.mubr.msk.bf16.mxu1 %vm873_vm2, %v1252_v49 }
 0x744   : > { %2934 = vmatmul.mubr.msk.bf16.vlgmr.msra.gmra.mrb[8].mxu1 %vm873_vm2, %v1253_v63 }
 0x763   : > { %v1235_v5 = vpop.xlane.xlu0 %1234 }
 0x764   : > { %3239 = vrcp.f32 %v1235_v5 }
 0x765   : > { %3241 = vrcp.f32 %v1226_v2 }
 0x766   : > { %3243 = vrcp.f32 %v1232_v1 }
 0x767   : > { %v1354_v10 = vpop.permute.xlu0 %1353 }
 0x768   : > { %v1374_v14 = vsel %vm783_vm1, %v1354_v10, 0  ;;  %3065 = vmatprep.subr.msk.bf16.mxu1 %vm783_vm1, %v1354_v10 }
 0x769   : > { %2942 = vmatpush3.bf16.xpose.msra.mxu1 %v1374_v14 }
 0x76a   : > { %3066 = vmatprep.subr.msk.bf16.mxu1 %vm783_vm1, %v1356_v4 }
 0x76b   : > { %v1346_v28 = vpop.permute.xlu0 %1345 }
 0x76c   : > { %v1229_v52 = vpop.xlane.xlu1 %1228 }
 0x76d   : > { %3245 = vrcp.f32 %v1229_v52 }
 0x76e   : > { %v3240_v9 = vpop.eup %3239 }
 0x76f   : > { %v3242_v11 = vpop.eup %3241  ;;  %v1251_v18 = vmul.f32 %v3240_v9, %v3228_v34 }
 0x770   : > { %v3244_v15 = vpop.eup %3243  ;;  %v1248_v27 = vmul.f32 %v3242_v11, %v3754_v16  ;;  %v1360_v31 = vpop.permute.xlu1 %1359 }
 0x771   : > { %2944 = vmatpush3.bf16.xpose.msra.mxu1 %v1377_v0  ;;  %v1250_v32 = vmul.f32 %v3244_v15, %v3749_v13  ;;  %v1383_v34 = vsel %vm783_vm1, %v1360_v31, 0 }
 0x772   : > { %3067 = vmatprep.subr.msk.bf16.mxu1 %vm783_vm1, %v1358_v12 }
 0x773   : > { %v1255_v35 = vpack.c.bf16 %v1251_v18, %v1250_v32 }
 0x774   : > { %v1348_v16 = vpop.permute.xlu1 %1347 }
 0x777   : > { %v3246_v17 = vpop.eup %3245 }
 0x778   : > { %v1249_v30 = vmul.f32 %v3246_v17, %v3230_v37  ;;  %v1350_v37 = vpop.permute.xlu0 %1349  ;;  %v1352_v13 = vpop.permute.xlu1 %1351 }
 0x779   : > { %2946 = vmatpush3.bf16.xpose.msra.mxu1 %v1380_v23 }
 0x77a   : > { %3068 = vmatprep.subr.msk.bf16.mxu1 %vm783_vm1, %v1360_v31  ;;  %v1254_v33 = vpack.c.bf16 %v1249_v30, %v1248_v27 }
 0x77c   : > { %2937 = vmatprep.mubr.msk.bf16.mxu1 %vm873_vm2, %v1254_v33 }
 0x77d   : > { %2938 = vmatmul.mubr.msk.bf16.gmra.mrb[12].mxu1 %vm873_vm2, %v1255_v35 }
 0x77e   : > { %2949 = vmatprep.mubr.msk.bf16.mxu1 %vm783_vm1, %v1346_v28 }
 0x781   : > { %2948 = vmatpush3.bf16.xpose.msra.mxu1 %v1383_v34 }
 0x788   : > { %2950 = vmatmul.mubr.msk.bf16.vlgmr.msra.gmra.mrb[16].mxu1 %vm783_vm1, %v1348_v16 }
 0x789   : > { %2953 = vmatprep.mubr.msk.bf16.mxu1 %vm783_vm1, %v1350_v37 }
 0x790   : > { %2954 = vmatmul.mubr.msk.bf16.gmra.mrb[20].mxu1 %vm783_vm1, %v1352_v13 }
 0x817   : > { %v3790_v20 = vpop.f32.mrb[8].mxu1 }
 0x818   : > { %v3792_v22 = vpop.f32.mrb[9].mxu1 }
 0x819   : > { %v3794_v41 = vpop.f32.mrb[10].mxu1 }
 0x81a   : > { %v3100_v43 = vpack.i.bf16 %v3794_v41, %v3790_v20  ;;  %v3798_v21 = vpop.f32.mrb[11].mxu1 }
 0x81b   : > { %v3095_v45 = vpack.i.bf16 %v3798_v21, %v3792_v22 }
 0x850   : > { %v3802_v50 = vpop.f32.mrb[12].mxu1 }
 0x851   : > { %v3804_v51 = vpop.f32.mrb[13].mxu1 }
 0x852   : > { %v3806_v29 = vpop.f32.mrb[14].mxu1 }
 0x853   : > { %v3120_v47 = vpack.i.bf16 %v3806_v29, %v3802_v50  ;;  %v3810_v44 = vpop.f32.mrb[15].mxu1 }
 0x854   : > { %v3115_v61 = vpack.i.bf16 %v3810_v44, %v3804_v51 }
 0x85b   : > { %v2951_v49 = vpop.f32.mrb[16].mxu1 }
 0x85c   : > { %v1428_v63 = vadd.f32 %v2951_v49, %v3585_v36  ;;  %v1419_v1 = vpop.f32.mrb[17].mxu1 }
 0x85d   : > { %v2952_v2 = vpop.f32.mrb[18].mxu1  ;;  %v1420_v4 = vadd.f32 %v1419_v1, %v3590_v40 }
 0x85e   : > { %v1422_v5 = vpop.f32.mrb[19].mxu1  ;;  %v1456_v10 = vsel %vm873_vm2, %v1428_v63, -inf  ;;  %v1431_v52 = vadd.f32 %v2952_v2, %v3603_v46 }
 0x85f   : > { %v1423_v12 = vadd.f32 %v1422_v5, %v3596_v42  ;;  %1457 = vmax.xlane.f32.xlu0 %v1456_v10  ;;  %v1450_v0 = vsel %vm873_vm2, %v1420_v4, -inf }
 0x860   : > { %v1459_v17 = vsel %vm873_vm2, %v1431_v52, -inf }
 0x861   : > { %v1453_v14 = vsel %vm873_vm2, %v1423_v12, -inf }
 0x862   : > { %1454 = vmax.xlane.f32.xlu1 %v1453_v14 }
 0x863   : > { %1451 = vmax.xlane.f32.xlu0 %v1450_v0  ;;  %v2955_v9 = vpop.f32.mrb[20].mxu1 }
 0x864   : > { %v1435_v36 = vpop.f32.mrb[21].mxu1  ;;  %v1444_v15 = vadd.f32 %v2955_v9, %v3612_v38 }
 0x865   : > { %v2956_v11 = vpop.f32.mrb[22].mxu1  ;;  %v1436_v42 = vadd.f32 %v1435_v36, %v3619_v39 }
 0x866   : > { %v1438_v40 = vpop.f32.mrb[23].mxu1  ;;  %v1468_v18 = vsel %vm873_vm2, %v1444_v15, -inf  ;;  %v3830_v38 = vadd.f32 %v2956_v11, %v3630_v60 }
 0x867   : > { %1460 = vmax.xlane.f32.xlu0 %v1459_v17  ;;  %v1462_v46 = vsel %vm873_vm2, %v1436_v42, -inf  ;;  %v3833_v23 = vadd.f32 %v1438_v40, %v3638_v62 }
 0x868   : > { %v1471_v39 = vsel %vm873_vm2, %v3830_v38, -inf }
 0x869   : > { %v1465_v27 = vsel %vm873_vm2, %v3833_v23, -inf }
 0x86b   : > { %1469 = vmax.xlane.f32.xlu0 %v1468_v18 }
 0x86f   : > { %1463 = vmax.xlane.f32.xlu0 %v1462_v46 }
 0x873   : > { %1544 = vrot.lane.b32.xlu1 %v3546_v3, %s3358_s25 }
 0x877   : > { %1546 = vrot.lane.b32.xlu1 %v3560_v24, %s3358_s25 }
 0x885   : > { %1542 = vrot.lane.b32.xlu0 %v3548_v6, %s3358_s25 }
 0x89b   : > { %1472 = vmax.xlane.f32.xlu1 %v1471_v39 }
 0x89f   : > { %1466 = vmax.xlane.f32.xlu1 %v1465_v27 }
 0x8b0   : > { %1548 = vrot.lane.b32.xlu1 %v3558_v19, %s3358_s25 }
 0x8ec   : > { %v1458_v30 = vpop.xlane.xlu0 %1457 }
 0x8ed   : > { %v1476_v31 = vsub.f32 %v1428_v63, %v1458_v30 }
 0x8ef   : > { %v1486_v32 = vmul.f32 1.442695, %v1476_v31  ;;  %v1455_v33 = vpop.xlane.xlu1 %1454 }
 0x8f0   : > { %v1452_v35 = vpop.xlane.xlu0 %1451  ;;  %v1475_v28 = vsub.f32 %v1423_v12, %v1455_v33 }
 0x8f1   : > { %3247 = vpow2.f32 %v1486_v32  ;;  %v1474_v60 = vsub.f32 %v1420_v4, %v1452_v35 }
 0x8f2   : > { %v1484_v37 = vmul.f32 1.442695, %v1475_v28 }
 0x8f3   : > { %v1482_v62 = vmul.f32 1.442695, %v1474_v60 }
 0x8f4   : > { %v1461_v34 = vpop.xlane.xlu0 %1460 }
 0x8f5   : > { %3249 = vpow2.f32 %v1482_v62  ;;  %v1477_v16 = vsub.f32 %v1431_v52, %v1461_v34  ;;  %v1545_v52 = vpop.permute.xlu1 %1544 }
 0x8f7   : > { %v1488_v13 = vmul.f32 1.442695, %v1477_v16 }
 0x8f8   : > { %v1470_v49 = vpop.xlane.xlu0 %1469 }
 0x8f9   : > { %3251 = vpow2.f32 %v1488_v13  ;;  %v1480_v1 = vsub.f32 %v1444_v15, %v1470_v49  ;;  %v1547_v40 = vpop.permute.xlu1 %1546 }
 0x8fa   : > { %3253 = vpow2.f32 %v1484_v37 }
 0x8fb   : > { %v3840_v2 = vpop.eup %3247  ;;  %v1494_v5 = vmul.f32 1.442695, %v1480_v1 }
 0x8fc   : > { %v1464_v63 = vpop.xlane.xlu0 %1463  ;;  %v1504_v10 = vsel %vm873_vm2, %v3840_v2, 0.0 }
 0x8fd   : > { %3255 = vpow2.f32 %v1494_v5  ;;  %v1478_v4 = vsub.f32 %v1436_v42, %v1464_v63  ;;  %1505 = vadd.xlane.f32.xlu0 %v1504_v10 }
 0x8ff   : > { %v3844_v12 = vpop.eup %3249  ;;  %v1490_v14 = vmul.f32 1.442695, %v1478_v4 }
 0x900   : > { %v1543_v0 = vpop.permute.xlu0 %1542  ;;  %v1498_v9 = vsel %vm873_vm2, %v3844_v12, 0.0 }
 0x901   : > { %3257 = vpow2.f32 %v1490_v14  ;;  %1499 = vadd.xlane.f32.xlu0 %v1498_v9  ;;  %2957 = vmatprep.subr.bf16.mxu0 %v1543_v0 }
 0x902   : > { %2958 = vmatpush3.bf16.msra.mxu0 %v1543_v0 }
 0x903   : > { %v3252_v36 = vpop.eup %3251  ;;  %2959 = vmatprep.subr.bf16.mxu0 %v1545_v52 }
 0x904   : > { %v1507_v11 = vsel %vm873_vm2, %v3252_v36, 0.0  ;;  %v3254_v15 = vpop.eup %3253 }
 0x905   : > { %1508 = vadd.xlane.f32.xlu1 %v1507_v11  ;;  %v1501_v42 = vsel %vm873_vm2, %v3254_v15, 0.0 }
 0x906   : > { %2960 = vmatpush3.bf16.msra.mxu0 %v1545_v52 }
 0x907   : > { %v3849_v17 = vpop.eup %3255  ;;  %2961 = vmatprep.subr.bf16.mxu0 %v1547_v40 }
 0x908   : > { %v1516_v18 = vsel %vm873_vm2, %v3849_v17, 0.0 }
 0x909   : > { %1502 = vadd.xlane.f32.xlu1 %v1501_v42  ;;  %1517 = vadd.xlane.f32.xlu0 %v1516_v18 }
 0x90a   : > { %2962 = vmatpush3.bf16.msra.mxu0 %v1547_v40 }
 0x90b   : > { %v3854_v46 = vpop.eup %3257 }
 0x90c   : > { %v1510_v39 = vsel %vm873_vm2, %v3854_v46, 0.0 }
 0x90d   : > { %1511 = vadd.xlane.f32.xlu0 %v1510_v39 }
 0x91a   : > { %1641 = vrot.lane.b32.xlu1 %v3546_v3, %s3359_s26 }
 0x91e   : > { %1643 = vrot.lane.b32.xlu1 %v3560_v24, %s3359_s26 }
 0x928   : > { %v1473_v27 = vpop.xlane.xlu1 %1472 }
 0x929   : > { %v1481_v30 = vsub.f32 %v3830_v38, %v1473_v27 }
 0x92b   : > { %v1496_v31 = vmul.f32 1.442695, %v1481_v30 }
 0x92c   : > { %v1467_v32 = vpop.xlane.xlu1 %1466 }
 0x92d   : > { %3259 = vpow2.f32 %v1496_v31  ;;  %v1479_v33 = vsub.f32 %v3833_v23, %v1467_v32 }
 0x92f   : > { %v1492_v35 = vmul.f32 1.442695, %v1479_v33 }
 0x930   : > { %v1549_v60 = vpop.permute.xlu1 %1548 }
 0x931   : > { %2963 = vmatprep.subr.bf16.mxu0 %v1549_v60  ;;  %3261 = vpow2.f32 %v1492_v35 }
 0x932   : > { %2964 = vmatpush3.bf16.msra.mxu0 %v1549_v60 }
 0x937   : > { %v3260_v28 = vpop.eup %3259 }
 0x938   : > { %v1519_v62 = vsel %vm873_vm2, %v3260_v28, 0.0 }
 0x939   : > { %1520 = vadd.xlane.f32.xlu0 %v1519_v62 }
 0x93b   : > { %v3262_v34 = vpop.eup %3261 }
 0x93c   : > { %v1513_v16 = vsel %vm873_vm2, %v3262_v34, 0.0 }
 0x942   : > { %1514 = vadd.xlane.f32.xlu1 %v1513_v16 }
 0x94f   : > { %1639 = vrot.lane.b32.xlu0 %v3548_v6, %s3359_s26 }
 0x953   : > { %1645 = vrot.lane.b32.xlu1 %v3558_v19, %s3359_s26  ;;  %1631 = vrot.lane.b32.xlu0 %v3553_v8, %s3360_s27 }
 0x957   : > { %1633 = vrot.lane.b32.xlu1 %v3550_v7, %s3360_s27  ;;  %1635 = vrot.lane.b32.xlu0 %v3564_v26, %s3360_s27 }
 0x95b   : > { %1637 = vrot.lane.b32.xlu1 %v3562_v25, %s3360_s27 }
 0x98a   : > { %v1506_v38 = vpop.xlane.xlu0 %1505 }
 0x98e   : > { %v1500_v23 = vpop.xlane.xlu0 %1499 }
 0x992   : > { %v1509_v37 = vpop.xlane.xlu1 %1508 }
 0x993   : > { %3263 = vrcp.f32 %v1509_v37 }
 0x994   : > { %3265 = vrcp.f32 %v1500_v23 }
 0x995   : > { %3267 = vrcp.f32 %v1506_v38 }
 0x996   : > { %v1503_v13 = vpop.xlane.xlu1 %1502  ;;  %v1518_v14 = vpop.xlane.xlu0 %1517 }
 0x997   : > { %3269 = vrcp.f32 %v1503_v13 }
 0x99a   : > { %v1512_v52 = vpop.xlane.xlu0 %1511  ;;  %v1642_v0 = vpop.permute.xlu1 %1641 }
 0x99d   : > { %v3264_v49 = vpop.eup %3263 }
 0x99e   : > { %v3266_v1 = vpop.eup %3265  ;;  %v1533_v10 = vmul.f32 %v3264_v49, %v3252_v36  ;;  %v1644_v40 = vpop.permute.xlu1 %1643 }
 0x99f   : > { %v3268_v5 = vpop.eup %3267  ;;  %v1530_v8 = vmul.f32 %v3266_v1, %v3844_v12  ;;  %v1663_v12 = vsel %vm783_vm1, %v1642_v0, 0  ;;  %v1666_v30 = vsel %vm783_vm1, %v1644_v40, 0 }
 0x9a0   : > { %v1532_v26 = vmul.f32 %v3268_v5, %v3840_v2 }
 0x9a1   : > { %v3270_v63 = vpop.eup %3269 }
 0x9a2   : > { %v1531_v7 = vmul.f32 %v3270_v63, %v3254_v15  ;;  %v1539_v25 = vpack.c.bf16 %v1533_v10, %v1532_v26 }
 0x9a4   : > { %v1538_v4 = vpack.c.bf16 %v1531_v7, %v1530_v8 }
 0x9a6   : > { %2965 = vmatprep.mubr.msk.bf16.mxu0 %vm873_vm2, %v1538_v4 }
 0x9a7   : > { %2966 = vmatmul.mubr.msk.bf16.vlgmr.msra.gmra.mrb[24].mxu0 %vm873_vm2, %v1539_v25 }
 0x9c6   : > { %v1521_v9 = vpop.xlane.xlu0 %1520 }
 0x9c7   : > { %3271 = vrcp.f32 %v1521_v9 }
 0x9c8   : > { %3273 = vrcp.f32 %v1512_v52 }
 0x9c9   : > { %3275 = vrcp.f32 %v1518_v14  ;;  %v3327_v14 = vld [vmem:[%s4228_s1] sm:$0xff] }
 0x9ca   : > { %v1640_v11 = vpop.permute.xlu0 %1639 }
 0x9cb   : > { %v1660_v42 = vsel %vm783_vm1, %v1640_v11, 0  ;;  %3069 = vmatprep.subr.msk.bf16.mxu0 %vm783_vm1, %v1640_v11  ;;  %v3328_v11 = vld [vmem:[%s4228_s1 + $0x10] sm:$0xff] }
 0x9cc   : > { %2974 = vmatpush3.bf16.xpose.msra.mxu0 %v1660_v42  ;;  %v3329_v42 = vld [vmem:[%s4228_s1 + $0x8] sm:$0xff] }
 0x9cd   : > { %3070 = vmatprep.subr.msk.bf16.mxu0 %vm783_vm1, %v1642_v0 }
 0x9ce   : > { %v1632_v16 = vpop.permute.xlu0 %1631 }
 0x9cf   : > { %v1515_v2 = vpop.xlane.xlu1 %1514 }
 0x9d0   : > { %3277 = vrcp.f32 %v1515_v2 }
 0x9d1   : > { %v3272_v36 = vpop.eup %3271 }
 0x9d2   : > { %v3274_v15 = vpop.eup %3273  ;;  %v1537_v27 = vmul.f32 %v3272_v36, %v3260_v28 }
 0x9d3   : > { %v3276_v18 = vpop.eup %3275  ;;  %v1534_v31 = vmul.f32 %v3274_v15, %v3854_v46  ;;  %v1646_v33 = vpop.permute.xlu1 %1645  ;;  %v3330_v15 = vld [vmem:[%s4228_s1 + $0x18] sm:$0xff] }
 0x9d4   : > { %2976 = vmatpush3.bf16.xpose.msra.mxu0 %v1663_v12  ;;  %v1536_v35 = vmul.f32 %v3276_v18, %v3849_v17  ;;  %v1669_v28 = vsel %vm783_vm1, %v1646_v33, 0 }
 0x9d5   : > { %3071 = vmatprep.subr.msk.bf16.mxu0 %vm783_vm1, %v1644_v40 }
 0x9d6   : > { %v1541_v62 = vpack.c.bf16 %v1537_v27, %v1536_v35 }
 0x9d7   : > { %v1634_v46 = vpop.permute.xlu1 %1633 }
 0x9da   : > { %v3278_v39 = vpop.eup %3277 }
 0x9db   : > { %v1535_v32 = vmul.f32 %v3278_v39, %v3262_v34  ;;  %v1636_v34 = vpop.permute.xlu0 %1635  ;;  %v1638_v17 = vpop.permute.xlu1 %1637 }
 0x9dc   : > { %2978 = vmatpush3.bf16.xpose.msra.mxu0 %v1666_v30 }
 0x9dd   : > { %3072 = vmatprep.subr.msk.bf16.mxu0 %vm783_vm1, %v1646_v33  ;;  %v1540_v60 = vpack.c.bf16 %v1535_v32, %v1534_v31  ;;  %v3331_v33 = vld [vmem:[%s4228_s1 + $0x20] sm:$0xff] }
 0x9df   : > { %2969 = vmatprep.mubr.msk.bf16.mxu0 %vm873_vm2, %v1540_v60  ;;  %v3332_v60 = vld [vmem:[%s4228_s1 + $0x28] sm:$0xff] }
 0x9e0   : > { %2970 = vmatmul.mubr.msk.bf16.gmra.mrb[28].mxu0 %vm873_vm2, %v1541_v62 }
 0x9e1   : > { %2981 = vmatprep.mubr.msk.bf16.mxu0 %vm783_vm1, %v1632_v16 }
 0x9e4   : > { %2980 = vmatpush3.bf16.xpose.msra.mxu0 %v1669_v28  ;;  %v3333_v28 = vld [vmem:[%s4228_s1 + $0x38] sm:$0xff] }
 0x9eb   : > { %2982 = vmatmul.mubr.msk.bf16.vlgmr.msra.gmra.mrb[32].mxu0 %vm783_vm1, %v1634_v46 }
 0x9ec   : > { %2985 = vmatprep.mubr.msk.bf16.mxu0 %vm783_vm1, %v1636_v34 }
 0x9f3   : > { %2986 = vmatmul.mubr.msk.bf16.gmra.mrb[36].mxu0 %vm783_vm1, %v1638_v17  ;;  %v3334_v17 = vld [vmem:[%s4228_s1 + $0x30] sm:$0xff] }
 0xa7a   : > { %v3890_v38 = vpop.f32.mrb[24].mxu0 }
 0xa7b   : > { %v3892_v23 = vpop.f32.mrb[25].mxu0 }
 0xa7c   : > { %v3894_v37 = vpop.f32.mrb[26].mxu0 }
 0xa7d   : > { %v3110_v13 = vpack.i.bf16 %v3894_v37, %v3890_v38  ;;  %v3898_v49 = vpop.f32.mrb[27].mxu0 }
 0xa7e   : > { %v3105_v1 = vpack.i.bf16 %v3898_v49, %v3892_v23 }
 0xab3   : > { %v3902_v5 = vpop.f32.mrb[28].mxu0 }
 0xab4   : > { %v3904_v63 = vpop.f32.mrb[29].mxu0 }
 0xab5   : > { %v3906_v10 = vpop.f32.mrb[30].mxu0 }
 0xab6   : > { %v3140_v8 = vpack.i.bf16 %v3906_v10, %v3902_v5  ;;  %v3910_v7 = vpop.f32.mrb[31].mxu0 }
 0xab7   : > { %v3135_v26 = vpack.i.bf16 %v3910_v7, %v3904_v63 }
 0xabe   : > { %v2983_v4 = vpop.f32.mrb[32].mxu0 }
 0xabf   : > { %v1705_v25 = vpop.f32.mrb[33].mxu0  ;;  %v1714_v40 = vadd.f32 %v3328_v11, %v2983_v4 }
 0xac0   : > { %v1706_v52 = vadd.f32 %v3327_v14, %v1705_v25  ;;  %v2984_v0 = vpop.f32.mrb[34].mxu0 }
 0xac1   : > { %v1708_v9 = vpop.f32.mrb[35].mxu0  ;;  %v1717_v18 = vadd.f32 %v3330_v15, %v2984_v0  ;;  %v1742_v27 = vsel %vm873_vm2, %v1714_v40, -inf }
 0xac2   : > { %v1709_v2 = vadd.f32 %v3329_v42, %v1708_v9  ;;  %v1736_v12 = vsel %vm873_vm2, %v1706_v52, -inf }
 0xac3   : > { %1737 = vmax.xlane.f32.xlu0 %v1736_v12  ;;  %v1745_v16 = vsel %vm873_vm2, %v1717_v18, -inf }
 0xac4   : > { %v1739_v36 = vsel %vm873_vm2, %v1709_v2, -inf }
 0xac5   : > { %1740 = vmax.xlane.f32.xlu1 %v1739_v36 }
 0xac6   : > { %v2987_v39 = vpop.f32.mrb[36].mxu0 }
 0xac7   : > { %1743 = vmax.xlane.f32.xlu0 %v1742_v27  ;;  %v1721_v30 = vpop.f32.mrb[37].mxu0  ;;  %v1730_v4 = vadd.f32 %v3334_v17, %v2987_v39 }
 0xac8   : > { %v2988_v31 = vpop.f32.mrb[38].mxu0  ;;  %v1722_v35 = vadd.f32 %v3331_v33, %v1721_v30 }
 0xac9   : > { %v1724_v32 = vpop.f32.mrb[39].mxu0  ;;  %v3941_v46 = vadd.f32 %v3333_v28, %v2988_v31  ;;  %v1754_v0 = vsel %vm873_vm2, %v1730_v4, -inf }
 0xaca   : > { %v3935_v62 = vadd.f32 %v3332_v60, %v1724_v32  ;;  %v1748_v25 = vsel %vm873_vm2, %v1722_v35, -inf }
 0xacb   : > { %1746 = vmax.xlane.f32.xlu0 %v1745_v16  ;;  %v1757_v14 = vsel %vm873_vm2, %v3941_v46, -inf }
 0xacc   : > { %v1751_v34 = vsel %vm873_vm2, %v3935_v62, -inf }
 0xacd   : > { %1752 = vmax.xlane.f32.xlu1 %v1751_v34 }
 0xacf   : > { %1749 = vmax.xlane.f32.xlu0 %v1748_v25 }
 0xad1   : > { %1758 = vmax.xlane.f32.xlu1 %v1757_v14 }
 0xad3   : > { %1755 = vmax.xlane.f32.xlu0 %v1754_v0 }
 0xb50   : > { %v1738_v9 = vpop.xlane.xlu0 %1737 }
 0xb51   : > { %v1760_v11 = vsub.f32 %v1706_v52, %v1738_v9 }
 0xb52   : > { %v1741_v42 = vpop.xlane.xlu1 %1740 }
 0xb53   : > { %v1768_v15 = vmul.f32 1.442695, %v1760_v11  ;;  %v1761_v27 = vsub.f32 %v1709_v2, %v1741_v42 }
 0xb54   : > { %v1744_v12 = vpop.xlane.xlu0 %1743 }
 0xb55   : > { %v1762_v36 = vsub.f32 %v1714_v40, %v1744_v12  ;;  %v1770_v32 = vmul.f32 1.442695, %v1761_v27 }
 0xb57   : > { %v1772_v30 = vmul.f32 1.442695, %v1762_v36 }
 0xb58   : > { %v1747_v31 = vpop.xlane.xlu0 %1746 }
 0xb59   : > { %3279 = vpow2.f32 %v1772_v30  ;;  %v1763_v39 = vsub.f32 %v1717_v18, %v1747_v31 }
 0xb5a   : > { %3281 = vpow2.f32 %v1768_v15  ;;  %v1753_v36 = vpop.xlane.xlu1 %1752 }
 0xb5b   : > { %v1774_v33 = vmul.f32 1.442695, %v1763_v39 }
 0xb5c   : > { %v1750_v60 = vpop.xlane.xlu0 %1749 }
 0xb5d   : > { %3283 = vpow2.f32 %v1774_v33  ;;  %v1764_v16 = vsub.f32 %v1722_v35, %v1750_v60 }
 0xb5e   : > { %3285 = vpow2.f32 %v1770_v32  ;;  %v1759_v15 = vpop.xlane.xlu1 %1758 }
 0xb5f   : > { %v1776_v52 = vmul.f32 1.442695, %v1764_v16  ;;  %v1767_v27 = vsub.f32 %v3941_v46, %v1759_v15 }
 0xb60   : > { %v1756_v28 = vpop.xlane.xlu0 %1755 }
 0xb61   : > { %v1766_v34 = vsub.f32 %v1730_v4, %v1756_v28 }
 0xb63   : > { %v3952_v17 = vpop.eup %3279  ;;  %v1780_v25 = vmul.f32 1.442695, %v1766_v34 }
 0xb64   : > { %v1790_v40 = vsel %vm873_vm2, %v3952_v17, 0.0  ;;  %v3282_v2 = vpop.eup %3281 }
 0xb65   : > { %3287 = vpow2.f32 %v1780_v25  ;;  %1791 = vadd.xlane.f32.xlu0 %v1790_v40  ;;  %v1784_v14 = vsel %vm873_vm2, %v3282_v2, 0.0 }
 0xb66   : > { %3289 = vpow2.f32 %v1776_v52 }
 0xb67   : > { %v3956_v18 = vpop.eup %3283 }
 0xb68   : > { %v1793_v35 = vsel %vm873_vm2, %v3956_v18, 0.0  ;;  %v3286_v0 = vpop.eup %3285 }
 0xb69   : > { %1785 = vadd.xlane.f32.xlu0 %v1784_v14  ;;  %1794 = vadd.xlane.f32.xlu1 %v1793_v35  ;;  %v1787_v4 = vsel %vm873_vm2, %v3286_v0, 0.0  ;;  %v3158_v35 = vld [vmem:[%s4233_s6 + $0x8] sm:$0xff]  }
 0xb6d   : > { %1788 = vadd.xlane.f32.xlu1 %v1787_v4 }
 0xb6f   : > { %v3962_v9 = vpop.eup %3287 }
 0xb70   : > { %v1802_v11 = vsel %vm873_vm2, %v3962_v9, 0.0  ;;  %v3966_v42 = vpop.eup %3289 }
 0xb71   : > { %1803 = vadd.xlane.f32.xlu0 %v1802_v11  ;;  %v1796_v12 = vsel %vm873_vm2, %v3966_v42, 0.0 }
 0xb75   : > { %1797 = vadd.xlane.f32.xlu0 %v1796_v12 }
 0xb7e   : > { %1830 = vrot.lane.b32.xlu1 %v3546_v3, %s3361_s19  ;;  %v1765_v3 = vsub.f32 %v3935_v62, %v1753_v36 }
 0xb82   : > { %1832 = vrot.lane.b32.xlu1 %v3560_v24, %s3361_s19  ;;  %v1782_v24 = vmul.f32 1.442695, %v1767_v27 }
 0xb84   : > { %3291 = vpow2.f32 %v1782_v24 }
 0xb8b   : > { %1828 = vrot.lane.b32.xlu0 %v3548_v6, %s3361_s19  ;;  %v1778_v6 = vmul.f32 1.442695, %v1765_v3 }
 0xb8d   : > { %3293 = vpow2.f32 %v1778_v6 }
 0xb8e   : > { %v3292_v22 = vpop.eup %3291 }
 0xb8f   : > { %3096 = vrot.lane.b32.xlu0 %v3095_v45, %s3362_s22  ;;  %v1805_v21 = vsel %vm873_vm2, %v3292_v22, 0.0 }
 0xb93   : > { %3106 = vrot.lane.b32.xlu0 %v3105_v1, %s3363_s23 }
 0xb97   : > { %3116 = vrot.lane.b32.xlu0 %v3115_v61, %s3362_s22  ;;  %v3294_v45 = vpop.eup %3293 }
 0xb98   : > { %v1799_v46 = vsel %vm873_vm2, %v3294_v45, 0.0 }
 0xba6   : > { %1806 = vadd.xlane.f32.xlu1 %v1805_v21 }
 0xbaa   : > { %1800 = vadd.xlane.f32.xlu1 %v1799_v46 }
 0xbbb   : > { %1834 = vrot.lane.b32.xlu1 %v3558_v19, %s3361_s19  ;;  %s496_s19 = scalar_lea.vmem %s4242_s15, %s2692_s21 }
 0xbbf   : > { %3101 = vrot.lane.b32.xlu1 %v3100_v43, %s3362_s22 }
 0xbc3   : > { %3111 = vrot.lane.b32.xlu1 %v3110_v13, %s3363_s23 }
 0xbc7   : > { %3121 = vrot.lane.b32.xlu1 %v3120_v47, %s3362_s22 }
 0xbf2   : > { %v1792_v51 = vpop.xlane.xlu0 %1791 }
 0xbf6   : > { %v1795_v44 = vpop.xlane.xlu1 %1794  ;;  %v1786_v61 = vpop.xlane.xlu0 %1785 }
 0xbf7   : > { %3295 = vrcp.f32 %v1786_v61 }
 0xbfa   : > { %v1789_v23 = vpop.xlane.xlu1 %1788 }
 0xbfb   : > { %3297 = vrcp.f32 %v1789_v23 }
 0xbfc   : > { %3299 = vrcp.f32 %v1795_v44 }
 0xbfd   : > { %3301 = vrcp.f32 %v1792_v51 }
 0xbfe   : > { %v1804_v19 = vpop.xlane.xlu0 %1803  ;;  %v1831_v41 = vpop.permute.xlu1 %1830 }
 0xc01   : > { %v3296_v1 = vpop.eup %3295 }
 0xc02   : > { %v1798_v49 = vpop.xlane.xlu0 %1797  ;;  %v1816_v62 = vmul.f32 %v3296_v1, %v3282_v2  ;;  %v1833_v50 = vpop.permute.xlu1 %1832 }
 0xc05   : > { %v3298_v20 = vpop.eup %3297 }
 0xc06   : > { %v1829_v43 = vpop.permute.xlu0 %1828  ;;  %v1817_v30 = vmul.f32 %v3298_v20, %v3286_v0  ;;  %v3300_v47 = vpop.eup %3299 }
 0xc07   : > { %2989 = vmatprep.subr.bf16.mxu1 %v1829_v43  ;;  %v3302_v13 = vpop.eup %3301  ;;  %v1819_v31 = vmul.f32 %v3300_v47, %v3956_v18 }
 0xc08   : > { %2990 = vmatpush3.bf16.msra.mxu1 %v1829_v43  ;;  %v1824_v38 = vpack.c.bf16 %v1817_v30, %v1816_v62  ;;  %v1818_v32 = vmul.f32 %v3302_v13, %v3952_v17  ;;  %v3157_v17 = vld [vmem:[%s4233_s6] sm:$0xff]  }
 0xc09   : > { %2991 = vmatprep.subr.bf16.mxu1 %v1831_v41 }
 0xc0a   : > { %2997 = vmatprep.mubr.msk.bf16.mxu1 %vm873_vm2, %v1824_v38  ;;  %v1825_v33 = vpack.c.bf16 %v1819_v31, %v1818_v32  ;;  %v3097_v21 = vpop.permute.xlu0 %3096 }
 0xc0b   : > { %v3098_v51 = vunpack.i.l.bf16 %v3097_v21  ;;  %v3099_v44 = vunpack.i.h.bf16 %v3097_v21 }
 0xc0c   : > { %2992 = vmatpush3.bf16.msra.mxu1 %v1831_v41 }
 0xc0d   : > { %2993 = vmatprep.subr.bf16.mxu1 %v1833_v50 }
 0xc0e   : > { %v3107_v46 = vpop.permute.xlu0 %3106 }
 0xc0f   : > { %v3108_v5 = vunpack.i.l.bf16 %v3107_v46 }
 0xc10   : > { %2994 = vmatpush3.bf16.msra.mxu1 %v1833_v50 }
 0xc33   : > { %v1807_v29 = vpop.xlane.xlu1 %1806 }
 0xc34   : > { %3303 = vrcp.f32 %v1807_v29 }
 0xc35   : > { %3305 = vrcp.f32 %v1798_v49  ;;  %v2014_v49 = vsel %vm783_vm1, %v3704_v56, %v3099_v44 }
 0xc36   : > { %3307 = vrcp.f32 %v1804_v19  ;;  %v3109_v19 = vunpack.i.h.bf16 %v3107_v46 }
 0xc37   : > { %v1801_v37 = vpop.xlane.xlu1 %1800 }
 0xc38   : > { %3309 = vrcp.f32 %v1801_v37  ;;  %v2023_v56 = vsel %vm2021_vm3, %v2014_v49, %v3109_v19 }
 0xc3b   : > { %v1835_v39 = vpop.permute.xlu1 %1834 }
 0xc3c   : > { %2995 = vmatprep.subr.bf16.mxu1 %v1835_v39 }
 0xc3d   : > { %2996 = vmatpush3.bf16.msra.mxu1 %v1835_v39 }
 0xc3e   : > { %v3304_v60 = vpop.eup %3303  ;;  %3005 = vmatprep.subr.bf16.mxu1 %v3157_v17 }
 0xc3f   : > { %v3306_v16 = vpop.eup %3305  ;;  %v1823_v52 = vmul.f32 %v3304_v60, %v3292_v22  ;;  %v3102_v22 = vpop.permute.xlu1 %3101 }
 0xc40   : > { %2998 = vmatmul.mubr.msk.bf16.vlgmr.msra.gmra.mrb[24].mxu1 %vm873_vm2, %v1825_v33  ;;  %v3308_v28 = vpop.eup %3307  ;;  %v1820_v25 = vmul.f32 %v3306_v16, %v3966_v42  ;;  %v3104_v61 = vunpack.i.h.bf16 %v3102_v22  ;;  %v3103_v23 = vunpack.i.l.bf16 %v3102_v22  ;;  %v2736_v22 = vld [vmem:[%s4234_s7] ss:$0 sm:$0xff] }
 0xc41   : > { %v1822_v2 = vmul.f32 %v3308_v28, %v3962_v9  ;;  %3006 = vmatpush3.bf16.msra.mxu1 %v3157_v17 }
 0xc42   : > { %v3310_v34 = vpop.eup %3309  ;;  %3007 = vmatprep.subr.bf16.mxu1 %v3158_v35  ;;  %v2016_v41 = vsel %vm783_vm1, %v3702_v55, %v3104_v61  ;;  %v2015_v43 = vsel %vm783_vm1, %v3698_v53, %v3103_v23  ;;  %v3336_v23 = vld [vmem:[%s3461_s24 + $0x10] sm:$0xff] }
 0xc43   : > { %v1821_v40 = vmul.f32 %v3310_v34, %v3294_v45  ;;  %v1827_v18 = vpack.c.bf16 %v1823_v52, %v1822_v2  ;;  %v3112_v45 = vpop.permute.xlu1 %3111 }
 0xc44   : > { %v3114_v63 = vunpack.i.h.bf16 %v3112_v45  ;;  %v3113_v7 = vunpack.i.l.bf16 %v3112_v45 }
 0xc45   : > { %v1826_v14 = vpack.c.bf16 %v1821_v40, %v1820_v25  ;;  %3008 = vmatpush3.bf16.msra.mxu1 %v3158_v35 }
 0xc46   : > { %v2024_v50 = vsel %vm2021_vm3, %v2015_v43, %v3113_v7  ;;  %v3338_v43 = vld [vmem:[%s3461_s24 + $0x18] sm:$0xff] }
 0xc47   : > { %3001 = vmatprep.mubr.msk.bf16.mxu1 %vm873_vm2, %v1826_v14  ;;  %v3122_v10 = vpop.permute.xlu1 %3121 }
 0xc48   : > { %3002 = vmatmul.mubr.msk.bf16.gmra.mrb[28].mxu1 %vm873_vm2, %v1827_v18  ;;  %v3124_v60 = vunpack.i.h.bf16 %v3122_v10  ;;  %v3123_v16 = vunpack.i.l.bf16 %v3122_v10  ;;  %v3335_v10 = vld [vmem:[%s3461_s24] sm:$0xff] }
 0xc4a   : > { %v2020_v35 = vsel %vm783_vm1, %v3710_v58, %v3124_v60  ;;  %v3342_v60 = vld [vmem:[%s3461_s24 + $0x30] sm:$0xff] }
 0xd13   : > { %v2999_v0 = vpop.f32.mrb[24].mxu1 }
 0xd14   : > { %v1886_v4 = vpop.f32.mrb[25].mxu1 }
 0xd15   : > { %v3000_v9 = vpop.f32.mrb[26].mxu1 }
 0xd16   : > { %v3125_v11 = vpack.i.bf16 %v3000_v9, %v2999_v0  ;;  %v1889_v42 = vpop.f32.mrb[27].mxu1  ;;  %v2019_v0 = vsel %vm783_vm1, %v3706_v57, %v3123_v16 }
 0xd17   : > { %v3130_v12 = vpack.i.bf16 %v1889_v42, %v1886_v4 }
 0xd18   : > { %3126 = vrot.lane.b32.xlu1 %v3125_v11, %s3364_s29 }
 0xd19   : > { %3131 = vrot.lane.b32.xlu0 %v3130_v12, %s3364_s29 }
 0xd1b   : > { %v3003_v36 = vpop.f32.mrb[28].mxu1 }
 0xd1c   : > { %3141 = vrot.lane.b32.xlu1 %v3140_v8, %s3363_s23  ;;  %v1902_v15 = vpop.f32.mrb[29].mxu1  ;;  %v3117_v8 = vpop.permute.xlu0 %3116 }
 0xd1d   : > { %3136 = vrot.lane.b32.xlu0 %v3135_v26, %s3363_s23  ;;  %v3004_v27 = vpop.f32.mrb[30].mxu1  ;;  %v2013_v26 = vsel %vm783_vm1, %v3700_v54, %v3098_v51  ;;  %v2025_v54 = vsel %vm2021_vm3, %v2016_v41, %v3114_v63  ;;  %v3119_v37 = vunpack.i.h.bf16 %v3117_v8  ;;  %v3118_v55 = vunpack.i.l.bf16 %v3117_v8 }
 0xd1e   : > { %v3150_v3 = vpack.i.bf16 %v3004_v27, %v3003_v36  ;;  %v1905_v24 = vpop.f32.mrb[31].mxu1  ;;  %v2022_v1 = vsel %vm2021_vm3, %v2013_v26, %v3108_v5  ;;  %v3337_v26 = vld [vmem:[%s3461_s24 + $0x8] sm:$0xff] }
 0xd1f   : > { %v3145_v6 = vpack.i.bf16 %v1905_v24, %v1902_v15  ;;  %v2018_v14 = vsel %vm783_vm1, %v3712_v59, %v3119_v37  ;;  %v2017_v18 = vsel %vm783_vm1, %v3708_v48, %v3118_v55  ;;  %v3339_v37 = vld [vmem:[%s3461_s24 + $0x20] sm:$0xff] }
 0xd20   : > { %3151 = vrot.lane.b32.xlu1 %v3150_v3, %s3364_s29 }
 0xd21   : > { %3146 = vrot.lane.b32.xlu0 %v3145_v6, %s3364_s29 }
 0xd8a   : > { %v3127_v20 = vpop.permute.xlu1 %3126 }
 0xd8b   : > { %v3129_v62 = vunpack.i.h.bf16 %v3127_v20  ;;  %v3128_v30 = vunpack.i.l.bf16 %v3127_v20  ;;  %v3132_v38 = vpop.permute.xlu0 %3131 }
 0xd8c   : > { %v3134_v29 = vunpack.i.h.bf16 %v3132_v38  ;;  %v3133_v47 = vunpack.i.l.bf16 %v3132_v38 }
 0xd8d   : > { %v2034_v13 = vsel %vm2030_vm4, %v2025_v54, %v3129_v62  ;;  %v2033_v31 = vsel %vm2030_vm4, %v2024_v50, %v3128_v30 }
 0xd8e   : > { %v2040_v39 = vpack.c.bf16 %v2034_v13, %v2033_v31  ;;  %v2031_v53 = vsel %vm2030_vm4, %v2022_v1, %v3133_v47  ;;  %v2032_v32 = vsel %vm2030_vm4, %v2023_v56, %v3134_v29  ;;  %v3142_v33 = vpop.permute.xlu1 %3141  ;;  %v3340_v31 = vld [vmem:[%s3461_s24 + $0x28] sm:$0xff] }
 0xd8f   : > { %v2039_v28 = vpack.c.bf16 %v2032_v32, %v2031_v53  ;;  %v3137_v34 = vpop.permute.xlu0 %3136  ;;  %v3144_v52 = vunpack.i.h.bf16 %v3142_v33  ;;  %v3143_v25 = vunpack.i.l.bf16 %v3142_v33  ;;  %v3341_v53 = vld [vmem:[%s3461_s24 + $0x38] sm:$0xff] }
 0xd90   : > { %v3139_v40 = vunpack.i.h.bf16 %v3137_v34  ;;  %v3138_v2 = vunpack.i.l.bf16 %v3137_v34 }
 0xd91   : > { %3009 = vmatprep.mubr.msk.bf16.mxu1 %vm507_vm0, %v2039_v28  ;;  %v2029_v42 = vsel %vm2021_vm3, %v2020_v35, %v3144_v52  ;;  %v2028_v12 = vsel %vm2021_vm3, %v2019_v0, %v3143_v25 }
 0xd92   : > { %v3152_v17 = vpop.permute.xlu1 %3151  ;;  %3010 = vmatmul.mubr.msk.bf16.vlgmr.msra.gmra.mrb[32].mxu1 %vm507_vm0, %v2040_v39  ;;  %v2026_v48 = vsel %vm2021_vm3, %v2017_v18, %v3138_v2  ;;  %v2027_v15 = vsel %vm2021_vm3, %v2018_v14, %v3139_v40 }
 0xd93   : > { %v3154_v4 = vunpack.i.h.bf16 %v3152_v17  ;;  %v3153_v9 = vunpack.i.l.bf16 %v3152_v17  ;;  %v3147_v11 = vpop.permute.xlu0 %3146 }
 0xd94   : > { %v3149_v59 = vunpack.i.h.bf16 %v3147_v11  ;;  %v3148_v36 = vunpack.i.l.bf16 %v3147_v11 }
 0xd95   : > { %v2038_v27 = vsel %vm2030_vm4, %v2029_v42, %v3154_v4  ;;  %v2037_v58 = vsel %vm2030_vm4, %v2028_v12, %v3153_v9 }
 0xd96   : > { %v2042_v3 = vpack.c.bf16 %v2038_v27, %v2037_v58  ;;  %v2035_v57 = vsel %vm2030_vm4, %v2026_v48, %v3148_v36  ;;  %v2036_v24 = vsel %vm2030_vm4, %v2027_v15, %v3149_v59 }
 0xd97   : > { %v2041_v6 = vpack.c.bf16 %v2036_v24, %v2035_v57 }
 0xd99   : > { %3013 = vmatprep.mubr.msk.bf16.mxu1 %vm507_vm0, %v2041_v6 }
 0xd9a   : > { %3014 = vmatmul.mubr.msk.bf16.gmra.mrb[36].mxu1 %vm507_vm0, %v2042_v3 }
 0xe65   : > { %v3011_v21 = vpop.f32.mrb[32].mxu1 }
 0xe66   : > { %v2112_v45 = vpop.f32.mrb[33].mxu1  ;;  %v2121_v46 = vadd.f32 %v3011_v21, %v2736_v22 }
 0xe67   : > { %v2113_v51 = vadd.f32 %v2736_v22, %v2112_v45  ;;  %v3012_v44 = vpop.f32.mrb[34].mxu1 }
 0xe68   : > { %v2115_v5 = vpop.f32.mrb[35].mxu1  ;;  %v4063_v63 = vadd.f32 %v3336_v23, %v2121_v46  ;;  %v2124_v7 = vadd.f32 %v3012_v44, %v2736_v22 }
 0xe69   : > { %v4060_v8 = vadd.f32 %v3335_v10, %v2113_v51  ;;  %v2116_v61 = vadd.f32 %v2736_v22, %v2115_v5 }
 0xe6a   : > { %v4073_v62 = vadd.f32 %v3338_v43, %v2124_v7  ;;  %v2157_v50 = vsel %vm507_vm0, %v4063_v63, 0.0 }
 0xe6b   : > { %v4066_v19 = vadd.f32 %v3337_v26, %v2116_v61  ;;  %v2151_v49 = vsel %vm507_vm0, %v4060_v8, 0.0 }
 0xe6c   : > { %2152 = vadd.xlane.f32.xlu0 %v2151_v49  ;;  %v2160_v39 = vsel %vm507_vm0, %v4073_v62, 0.0 }
 0xe6d   : > { %v3015_v1 = vpop.f32.mrb[36].mxu1  ;;  %v2154_v20 = vsel %vm507_vm0, %v4066_v19, 0.0 }
 0xe6e   : > { %v2128_v41 = vpop.f32.mrb[37].mxu1  ;;  %2155 = vadd.xlane.f32.xlu1 %v2154_v20  ;;  %v2137_v56 = vadd.f32 %v3015_v1, %v2736_v22 }
 0xe6f   : > { %v2129_v30 = vadd.f32 %v2736_v22, %v2128_v41  ;;  %v3016_v38 = vpop.f32.mrb[38].mxu1 }
 0xe70   : > { %v2131_v54 = vpop.f32.mrb[39].mxu1  ;;  %2158 = vadd.xlane.f32.xlu0 %v2157_v50  ;;  %v2140_v29 = vadd.f32 %v3016_v38, %v2736_v22  ;;  %v4091_v16 = vadd.f32 %v3342_v60, %v2137_v56  ;;  %v3160_v38 = vld [vmem:[%s4237_s10 + $0x8] sm:$0xff]   ;;  %v3161_v50 = vld [vmem:[%s4239_s12] sm:$0xff]  }
 0xe71   : > { %v2132_v47 = vadd.f32 %v2736_v22, %v2131_v54  ;;  %v4078_v13 = vadd.f32 %v3339_v37, %v2129_v30  ;;  %v3159_v30 = vld [vmem:[%s4237_s10] sm:$0xff]   ;;  %v3162_v54 = vld [vmem:[%s4239_s12 + $0x8] sm:$0xff]   ;;  %3029 = vmatprep.subr.bf16.mxu1 %v3161_v50 }
 0xe72   : > { %v4086_v32 = vadd.f32 %v3341_v53, %v2140_v29  ;;  %v2169_v52 = vsel %vm507_vm0, %v4091_v16, 0.0  ;;  %3017 = vmatprep.subr.bf16.mxu0 %v3159_v30  ;;  %3030 = vmatpush3.bf16.msra.mxu1 %v3161_v50 }
 0xe73   : > { %v4081_v55 = vadd.f32 %v3340_v31, %v2132_v47  ;;  %v2163_v28 = vsel %vm507_vm0, %v4078_v13, 0.0  ;;  %3018 = vmatpush3.bf16.msra.mxu0 %v3159_v30  ;;  %3031 = vmatprep.subr.bf16.mxu1 %v3162_v54 }
 0xe74   : > { %2161 = vadd.xlane.f32.xlu0 %v2160_v39  ;;  %v2172_v34 = vsel %vm507_vm0, %v4086_v32, 0.0  ;;  %3019 = vmatprep.subr.bf16.mxu0 %v3160_v38 }
 0xe75   : > { %v2166_v33 = vsel %vm507_vm0, %v4081_v55, 0.0 }
 0xe76   : > { %2167 = vadd.xlane.f32.xlu1 %v2166_v33  ;;  %3032 = vmatpush3.bf16.msra.mxu1 %v3162_v54 }
 0xe77   : > { %3020 = vmatpush3.bf16.msra.mxu0 %v3160_v38 }
 0xe78   : > { %2164 = vadd.xlane.f32.xlu0 %v2163_v28 }
 0xe7a   : > { %2173 = vadd.xlane.f32.xlu1 %v2172_v34 }
 0xe7c   : > { %2170 = vadd.xlane.f32.xlu0 %v2169_v52 }
 0xef9   : > { %v2153_v25 = vpop.xlane.xlu0 %2152 }
 0xefa   : > { %v2175_v40 = vmul.f32 0.03125, %v2153_v25 }
 0xefb   : > { %v2156_v2 = vpop.xlane.xlu1 %2155 }
 0xefc   : > { %v4100_v14 = vsub.f32 %v4060_v8, %v2175_v40  ;;  %v2176_v18 = vmul.f32 0.03125, %v2156_v2 }
 0xefd   : > { %v2159_v17 = vpop.xlane.xlu0 %2158 }
 0xefe   : > { %v4103_v35 = vsub.f32 %v4066_v19, %v2176_v18  ;;  %v2177_v0 = vmul.f32 0.03125, %v2159_v17  ;;  %v2191_v4 = vmul.f32 %v4100_v14, %v4100_v14 }
 0xf00   : > { %v4108_v9 = vsub.f32 %v4063_v63, %v2177_v0  ;;  %v2199_v11 = vsel %vm507_vm0, %v2191_v4, 0.0  ;;  %v2192_v42 = vmul.f32 %v4103_v35, %v4103_v35  ;;  %v2743_v0 = vld [vmem:[%s4235_s8] ss:$0 sm:$0xff] }
 0xf01   : > { %2200 = vadd.xlane.f32.xlu0 %v2199_v11  ;;  %v2162_v12 = vpop.xlane.xlu0 %2161 }
 0xf02   : > { %v2178_v59 = vmul.f32 0.03125, %v2162_v12  ;;  %v2202_v36 = vsel %vm507_vm0, %v2192_v42, 0.0  ;;  %v2193_v48 = vmul.f32 %v4108_v9, %v4108_v9 }
 0xf03   : > { %2203 = vadd.xlane.f32.xlu1 %v2202_v36  ;;  %v2168_v15 = vpop.xlane.xlu1 %2167 }
 0xf04   : > { %v4117_v27 = vsub.f32 %v4073_v62, %v2178_v59  ;;  %v2180_v58 = vmul.f32 0.03125, %v2168_v15  ;;  %v2205_v3 = vsel %vm507_vm0, %v2193_v48, 0.0 }
 0xf05   : > { %2206 = vadd.xlane.f32.xlu0 %v2205_v3  ;;  %v2165_v57 = vpop.xlane.xlu0 %2164 }
 0xf06   : > { %v4121_v24 = vsub.f32 %v4081_v55, %v2180_v58  ;;  %v2179_v6 = vmul.f32 0.03125, %v2165_v57  ;;  %v2194_v22 = vmul.f32 %v4117_v27, %v4117_v27 }
 0xf07   : > { %v2174_v21 = vpop.xlane.xlu1 %2173 }
 0xf08   : > { %v4126_v45 = vsub.f32 %v4078_v13, %v2179_v6  ;;  %v2182_v46 = vmul.f32 0.03125, %v2174_v21  ;;  %v2208_v51 = vsel %vm507_vm0, %v2194_v22, 0.0  ;;  %v2196_v44 = vmul.f32 %v4121_v24, %v4121_v24  ;;  %v2744_v6 = vld [vmem:[%s4236_s9] ss:$0 sm:$0xff] }
 0xf09   : > { %2209 = vadd.xlane.f32.xlu1 %v2208_v51  ;;  %v2171_v5 = vpop.xlane.xlu0 %2170 }
 0xf0a   : > { %v4132_v10 = vsub.f32 %v4086_v32, %v2182_v46  ;;  %v2181_v61 = vmul.f32 0.03125, %v2171_v5  ;;  %v2195_v23 = vmul.f32 %v4126_v45, %v4126_v45  ;;  %v2214_v26 = vsel %vm507_vm0, %v2196_v44, 0.0 }
 0xf0c   : > { %v4137_v7 = vsub.f32 %v4091_v16, %v2181_v61  ;;  %v2211_v49 = vsel %vm507_vm0, %v2195_v23, 0.0  ;;  %v2198_v1 = vmul.f32 %v4132_v10, %v4132_v10 }
 0xf0d   : > { %2215 = vadd.xlane.f32.xlu1 %v2214_v26  ;;  %2212 = vadd.xlane.f32.xlu0 %v2211_v49 }
 0xf0e   : > { %v2197_v20 = vmul.f32 %v4137_v7, %v4137_v7  ;;  %v2220_v41 = vsel %vm507_vm0, %v2198_v1, 0.0 }
 0xf10   : > { %v2217_v43 = vsel %vm507_vm0, %v2197_v20, 0.0 }
 0xf11   : > { %2221 = vadd.xlane.f32.xlu1 %v2220_v41  ;;  %2218 = vadd.xlane.f32.xlu0 %v2217_v43 }
 0xf8e   : > { %v2201_v29 = vpop.xlane.xlu0 %2200 }
 0xf8f   : > { %v2223_v47 = vmul.f32 0.03125, %v2201_v29 }
 0xf90   : > { %v2204_v56 = vpop.xlane.xlu1 %2203 }
 0xf91   : > { %v2231_v37 = vadd.f32 1e-05, %v2223_v47  ;;  %v2224_v31 = vmul.f32 0.03125, %v2204_v56 }
 0xf92   : > { %v2207_v39 = vpop.xlane.xlu0 %2206 }
 0xf93   : > { %3311 = vrsqrt.f32 %v2231_v37  ;;  %v2232_v53 = vadd.f32 1e-05, %v2224_v31  ;;  %v2225_v33 = vmul.f32 0.03125, %v2207_v39 }
 0xf95   : > { %3313 = vrsqrt.f32 %v2232_v53  ;;  %v2233_v60 = vadd.f32 1e-05, %v2225_v33 }
 0xf96   : > { %v2210_v28 = vpop.xlane.xlu1 %2209 }
 0xf97   : > { %3315 = vrsqrt.f32 %v2233_v60  ;;  %v2226_v34 = vmul.f32 0.03125, %v2210_v28  ;;  %v3165_v60 = vld [vmem:[%s4241_s14] sm:$0xff]  }
 0xf98   : > { %3045 = vmatprep.subr.bf16.mxu0 %v3165_v60  ;;  %v2745_v28 = vld [vmem:[%s4238_s11] ss:$0 sm:$0xff] }
 0xf99   : > { %v2234_v52 = vadd.f32 1e-05, %v2226_v34 }
 0xf9a   : > { %v2216_v25 = vpop.xlane.xlu1 %2215  ;;  %v2213_v40 = vpop.xlane.xlu0 %2212 }
 0xf9b   : > { %3317 = vrsqrt.f32 %v2234_v52  ;;  %v2228_v2 = vmul.f32 0.03125, %v2216_v25  ;;  %v2227_v18 = vmul.f32 0.03125, %v2213_v40 }
 0xf9d   : > { %v3312_v17 = vpop.eup %3311  ;;  %v2236_v4 = vadd.f32 1e-05, %v2228_v2  ;;  %v2235_v11 = vadd.f32 1e-05, %v2227_v18 }
 0xf9e   : > { %v2247_v42 = vmul.f32 %v3312_v17, %v4100_v14  ;;  %v2222_v12 = vpop.xlane.xlu1 %2221  ;;  %v2219_v59 = vpop.xlane.xlu0 %2218 }
 0xf9f   : > { %v3314_v36 = vpop.eup %3313  ;;  %3319 = vrsqrt.f32 %v2236_v4  ;;  %v2230_v48 = vmul.f32 0.03125, %v2222_v12  ;;  %v2229_v15 = vmul.f32 0.03125, %v2219_v59 }
 0xfa0   : > { %v2248_v58 = vmul.f32 %v3314_v36, %v4103_v35  ;;  %3321 = vrsqrt.f32 %v2235_v11  ;;  %v2262_v3 = vmul.f32 %v2743_v0, %v2247_v42 }
 0xfa1   : > { %v3316_v57 = vpop.eup %3315  ;;  %v2238_v22 = vadd.f32 1e-05, %v2230_v48  ;;  %v2237_v21 = vadd.f32 1e-05, %v2229_v15 }
 0xfa2   : > { %v2249_v46 = vmul.f32 %v3316_v57, %v4108_v9  ;;  %v2263_v14 = vmul.f32 %v2743_v0, %v2248_v58  ;;  %v2277_v51 = vadd.f32 %v2744_v6, %v2262_v3 }
 0xfa3   : > { %3323 = vrsqrt.f32 %v2238_v22 }
 0xfa4   : > { %3325 = vrsqrt.f32 %v2237_v21  ;;  %v2278_v44 = vadd.f32 %v2744_v6, %v2263_v14  ;;  %v2264_v61 = vmul.f32 %v2743_v0, %v2249_v46 }
 0xfa5   : > { %v3318_v5 = vpop.eup %3317 }
 0xfa6   : > { %v2250_v35 = vmul.f32 %v3318_v5, %v4117_v27  ;;  %v2285_v23 = vpack.c.bf16 %v2278_v44, %v2277_v51  ;;  %v2279_v20 = vadd.f32 %v2744_v6, %v2264_v61 }
 0xfa8   : > { %v2265_v26 = vmul.f32 %v2743_v0, %v2250_v35  ;;  %3021 = vmatprep.mubr.msk.bf16.mxu0 %vm507_vm0, %v2285_v23  ;;  %v3166_v35 = vld [vmem:[%s4241_s14 + $0x8] sm:$0xff]   ;;  %v2752_v23 = vld [vmem:[%s4240_s13] ss:$0 sm:$0xff] }
 0xfa9   : > { %v3320_v49 = vpop.eup %3319 }
 0xfaa   : > { %v3322_v1 = vpop.eup %3321  ;;  %v2280_v41 = vadd.f32 %v2744_v6, %v2265_v26  ;;  %v2252_v43 = vmul.f32 %v3320_v49, %v4121_v24 }
 0xfab   : > { %v2251_v9 = vmul.f32 %v3322_v1, %v4126_v45 }
 0xfac   : > { %v2286_v30 = vpack.c.bf16 %v2280_v41, %v2279_v20  ;;  %v2267_v38 = vmul.f32 %v2743_v0, %v2252_v43 }
 0xfad   : > { %v3324_v50 = vpop.eup %3323  ;;  %v2266_v54 = vmul.f32 %v2743_v0, %v2251_v9 }
 0xfae   : > { %v3326_v29 = vpop.eup %3325  ;;  %v2254_v47 = vmul.f32 %v3324_v50, %v4132_v10  ;;  %3022 = vmatmul.mubr.msk.bf16.vlgmr.msra.gmra.mrb[40].mxu0 %vm507_vm0, %v2286_v30  ;;  %v2282_v27 = vadd.f32 %v2744_v6, %v2267_v38  ;;  %v3163_v10 = vld [vmem:[%s4239_s12 + $0x10] sm:$0xff]  }
 0xfaf   : > { %v2253_v56 = vmul.f32 %v3326_v29, %v4137_v7  ;;  %v2281_v37 = vadd.f32 %v2744_v6, %v2266_v54  ;;  %3033 = vmatprep.subr.bf16.mxu1 %v3163_v10  ;;  %v3164_v7 = vld [vmem:[%s4239_s12 + $0x18] sm:$0xff]   ;;  %3046 = vmatpush3.bf16.msra.mxu0 %v3165_v60 }
 0xfb0   : > { %v2269_v31 = vmul.f32 %v2743_v0, %v2254_v47  ;;  %3034 = vmatpush3.bf16.msra.mxu1 %v3163_v10  ;;  %3047 = vmatprep.subr.bf16.mxu0 %v3166_v35 }
 0xfb1   : > { %v2287_v39 = vpack.c.bf16 %v2282_v27, %v2281_v37  ;;  %v2268_v53 = vmul.f32 %v2743_v0, %v2253_v56  ;;  %3035 = vmatprep.subr.bf16.mxu1 %v3164_v7 }
 0xfb2   : > { %v2284_v33 = vadd.f32 %v2744_v6, %v2269_v31 }
 0xfb3   : > { %3025 = vmatprep.mubr.msk.bf16.mxu0 %vm507_vm0, %v2287_v39  ;;  %v2283_v24 = vadd.f32 %v2744_v6, %v2268_v53  ;;  %3048 = vmatpush3.bf16.msra.mxu0 %v3166_v35 }
 0xfb4   : > { %3036 = vmatpush3.bf16.msra.mxu1 %v3164_v7 }
 0xfb5   : > { %v2288_v45 = vpack.c.bf16 %v2284_v33, %v2283_v24 }
 0xfb7   : > { %3026 = vmatmul.mubr.msk.bf16.gmra.mrb[44].mxu0 %vm507_vm0, %v2288_v45 }
0x1081   : > { %v3023_v34 = vpop.f32.mrb[40].mxu0 }
0x1082   : > { %v2367_v52 = vadd.f32 %v3023_v34, %v2745_v28  ;;  %v2358_v25 = vpop.f32.mrb[41].mxu0 }
0x1083   : > { %v2359_v40 = vadd.f32 %v2745_v28, %v2358_v25  ;;  %v3024_v2 = vpop.f32.mrb[42].mxu0 }
0x1084   : > { %v2370_v18 = vadd.f32 %v3024_v2, %v2745_v28  ;;  %v2361_v17 = vpop.f32.mrb[43].mxu0  ;;  %v2391_v4 = vmax.f32 %v2367_v52, 0.0 }
0x1085   : > { %v2362_v0 = vadd.f32 %v2745_v28, %v2361_v17  ;;  %v2389_v42 = vmax.f32 %v2359_v40, 0.0 }
0x1086   : > { %v2392_v11 = vmax.f32 %v2370_v18, 0.0 }
0x1087   : > { %v2390_v12 = vmax.f32 %v2362_v0, 0.0 }
0x1088   : > { %v2398_v59 = vpack.c.bf16 %v2392_v11, %v2391_v4 }
0x1089   : > { %v2397_v36 = vpack.c.bf16 %v2390_v12, %v2389_v42 }
0x108a   : > { %v3027_v48 = vpop.f32.mrb[44].mxu0 }
0x108b   : > { %v2383_v15 = vadd.f32 %v3027_v48, %v2745_v28  ;;  %v2374_v58 = vpop.f32.mrb[45].mxu0  ;;  %3037 = vmatprep.mubr.msk.bf16.mxu1 %vm873_vm2, %v2397_v36 }
0x108c   : > { %v2375_v3 = vadd.f32 %v2745_v28, %v2374_v58  ;;  %v3028_v57 = vpop.f32.mrb[46].mxu0  ;;  %3038 = vmatmul.mubr.msk.bf16.vlgmr.msra.gmra.mrb[40].mxu1 %vm873_vm2, %v2398_v59 }
0x108d   : > { %v2386_v6 = vadd.f32 %v3028_v57, %v2745_v28  ;;  %v2377_v22 = vpop.f32.mrb[47].mxu0  ;;  %v2395_v46 = vmax.f32 %v2383_v15, 0.0 }
0x108e   : > { %v2378_v21 = vadd.f32 %v2745_v28, %v2377_v22  ;;  %v2393_v51 = vmax.f32 %v2375_v3, 0.0 }
0x108f   : > { %v2396_v14 = vmax.f32 %v2386_v6, 0.0 }
0x1090   : > { %v2394_v44 = vmax.f32 %v2378_v21, 0.0 }
0x1091   : > { %v2400_v5 = vpack.c.bf16 %v2396_v14, %v2395_v46 }
0x1092   : > { %v2399_v61 = vpack.c.bf16 %v2394_v44, %v2393_v51 }
0x1094   : > { %3041 = vmatprep.mubr.msk.bf16.mxu1 %vm873_vm2, %v2399_v61 }
0x1095   : > { %3042 = vmatmul.mubr.msk.bf16.gmra.mrb[44].mxu1 %vm873_vm2, %v2400_v5 }
0x115f   : > { %v3039_v26 = vpop.f32.mrb[40].mxu1 }
0x1160   : > { %v2495_v49 = vadd.f32 %v3039_v26, %v2752_v23  ;;  %v2486_v1 = vpop.f32.mrb[41].mxu1 }
0x1161   : > { %v2487_v20 = vadd.f32 %v2752_v23, %v2486_v1  ;;  %v3040_v41 = vpop.f32.mrb[42].mxu1 }
0x1162   : > { %v2498_v43 = vadd.f32 %v3040_v41, %v2752_v23  ;;  %v2489_v9 = vpop.f32.mrb[43].mxu1  ;;  %v2519_v38 = vadd.f32 %v2495_v49, %v4063_v63 }
0x1163   : > { %v2490_v30 = vadd.f32 %v2752_v23, %v2489_v9  ;;  %v2517_v54 = vadd.f32 %v2487_v20, %v4060_v8 }
0x1164   : > { %v2520_v50 = vadd.f32 %v2498_v43, %v4073_v62 }
0x1165   : > { %v2518_v29 = vadd.f32 %v2490_v30, %v4066_v19 }
0x1166   : > { %v2526_v47 = vpack.c.bf16 %v2520_v50, %v2519_v38 }
0x1167   : > { %v2525_v27 = vpack.c.bf16 %v2518_v29, %v2517_v54 }
0x1168   : > { %v3043_v56 = vpop.f32.mrb[44].mxu1 }
0x1169   : > { %v2511_v37 = vadd.f32 %v3043_v56, %v2752_v23  ;;  %v2502_v31 = vpop.f32.mrb[45].mxu1  ;;  %3049 = vmatprep.mubr.msk.bf16.mxu0 %vm507_vm0, %v2525_v27 }
0x116a   : > { %v2503_v39 = vadd.f32 %v2752_v23, %v2502_v31  ;;  %v3044_v53 = vpop.f32.mrb[46].mxu1  ;;  %3050 = vmatmul.mubr.msk.bf16.vlgmr.msra.gmra.mrb[48].mxu0 %vm507_vm0, %v2526_v47 }
0x116b   : > { %v2514_v33 = vadd.f32 %v3044_v53, %v2752_v23  ;;  %v2505_v63 = vpop.f32.mrb[47].mxu1  ;;  %v2523_v62 = vadd.f32 %v2511_v37, %v4091_v16 }
0x116c   : > { %v2506_v24 = vadd.f32 %v2752_v23, %v2505_v63  ;;  %v2521_v19 = vadd.f32 %v2503_v39, %v4078_v13 }
0x116d   : > { %v2524_v8 = vadd.f32 %v2514_v33, %v4086_v32 }
0x116e   : > { %v2522_v45 = vadd.f32 %v2506_v24, %v4081_v55 }
0x116f   : > { %v2528_v10 = vpack.c.bf16 %v2524_v8, %v2523_v62 }
0x1170   : > { %v2527_v7 = vpack.c.bf16 %v2522_v45, %v2521_v19 }
0x1172   : > { %3053 = vmatprep.mubr.msk.bf16.mxu0 %vm507_vm0, %v2527_v7 }
0x1173   : > { %3054 = vmatmul.mubr.msk.bf16.gmra.mrb[52].mxu0 %vm507_vm0, %v2528_v10 }
0x123d   : > { %v3051_v60 = vpop.f32.mrb[48].mxu0 }
0x123e   : > { %2624 = vst.msk [vmem:[%s496_s19 + $0x10] sm:$0xff] %vm507_vm0, %v3051_v60  ;;  %v2591_v16 = vpop.f32.mrb[49].mxu0 }
0x123f   : > { %2622 = vst.msk [vmem:[%s496_s19] sm:$0xff] %vm507_vm0, %v2591_v16  ;;  %v3052_v13 = vpop.f32.mrb[50].mxu0 }
0x1240   : > { %2625 = vst.msk [vmem:[%s496_s19 + $0x18] sm:$0xff] %vm507_vm0, %v3052_v13  ;;  %v2594_v55 = vpop.f32.mrb[51].mxu0 }
0x1241   : > { %2623 = vst.msk [vmem:[%s496_s19 + $0x8] sm:$0xff] %vm507_vm0, %v2594_v55 }
0x1246   : > { %v3055_v32 = vpop.f32.mrb[52].mxu0 }
0x1247   : > { %2628 = vst.msk [vmem:[%s496_s19 + $0x30] sm:$0xff] %vm507_vm0, %v3055_v32  ;;  %v2607_v28 = vpop.f32.mrb[53].mxu0 }
0x1248   : > { %2626 = vst.msk [vmem:[%s496_s19 + $0x20] sm:$0xff] %vm507_vm0, %v2607_v28  ;;  %v3056_v34 = vpop.f32.mrb[54].mxu0 }
0x1249   : > { %2629 = vst.msk [vmem:[%s496_s19 + $0x38] sm:$0xff] %vm507_vm0, %v3056_v34  ;;  %v2610_v52 = vpop.f32.mrb[55].mxu0 }
0x124a   : > { %2627 = vst.msk [vmem:[%s496_s19 + $0x28] sm:$0xff] %vm507_vm0, %v2610_v52 }
0x124b PF: > { %s25_s18 = sadd.s32 1, %s3349_s18  }
0x124c   : > { %p22_p4 = scmp.ge.s32.totalorder %s25_s18, 4  }
0x124e   :  { %24 = sbr.rel (!%p22_p4) target bundleno = 1 (0x1), region = 110 }

</bundles_post_ra>
